<compile_context>
chip_gen: v7x
topology: tpu7x:2x2x1
jax: 0.10.0
libtpu: 0.0.40
codegen_flags: <defaults>
</compile_context>

<pallas_src>
import functools

import numpy as np

import jax
import jax.numpy as jnp
from jax.experimental import pallas as pl
from jax.experimental.pallas import tpu as pltpu


# ----------------------------------------------------------------------------
# Fused kernel: in-VMEM im2col (once) + per-channel encoder row + streamed meta
# matmul with f32 accumulator.
# ----------------------------------------------------------------------------
def _fused_kernel(x_ref, mask_ref, cw_ref, cb_ref, wm_ref, mb_ref,   # inputs
                  o_ref,                                             # output
                  xcol_ref, acc_ref,                                 # scratch
                  *, B, C_in, W, taps):
    k = pl.program_id(1)
    last_k = pl.num_programs(1) - 1

    # --- prologue (once per output tile): zero accumulator, build im2col in VMEM
    @pl.when(k == 0)
    def _prologue():
        acc_ref[...] = jnp.zeros_like(acc_ref)
        for b in range(B):
            x_b = x_ref[b]                                    # (C_in, S) f32
            S = x_b.shape[1]
            for t, (dy, dx) in enumerate(taps):
                off = dy * W + dx
                if off == 0:
                    xs = x_b
                else:
                    # xs[:, s] = x_b[:, s + off]  (wrap-around killed by mask)
                    xs = pltpu.roll(x_b, shift=(-off) % S, axis=1)
                xs = xs * mask_ref[t:t + 1, :]                # zero image borders
                xcol_ref[b, t * C_in:(t + 1) * C_in, :] = xs

    # --- one encoder output channel (enc1 ch k, or enc2 ch k-C_enc) for all batches
    cw = cw_ref[0]                       # (1, 9*C_in) f32: this channel's tap weights
    bias_k = cb_ref[k]                   # f32 scalar from SMEM
    wm_k = wm_ref[0]                     # (S, tn) bf16: meta weight rows for channel k

    for b in range(B):
        r = jnp.dot(cw, xcol_ref[b], preferred_element_type=jnp.float32)   # (1, S)
        f = jnp.maximum(r + bias_k, 0.0).astype(wm_k.dtype)                # (1, S) bf16
        acc_ref[b:b + 1, :] += jnp.dot(f, wm_k, preferred_element_type=jnp.float32)

    # --- epilogue: add meta bias once and emit f32 output tile
    @pl.when(k == last_k)
    def _epilogue():
        o_ref[...] = (acc_ref[...] + mb_ref[...]).astype(o_ref.dtype)


# ----------------------------------------------------------------------------
# One-time (outside jit) parameter preparation: fold layout permutations into
# the weights so the forward pass does zero per-call weight transposes.
# ----------------------------------------------------------------------------
def prepare_params(params, H, W):
    w1 = params["enc1_w"]                # (C_enc, C_in, 3, 3)
    b1 = params["enc1_b"]                # (C_enc,)
    w2 = params["enc2_w"]                # (C_enc, C_in)
    b2 = params["enc2_b"]                # (C_enc,)
    wm = params["meta_w"]                # (out_dim, in_dim)  (PyTorch Linear layout)
    bm = params["meta_b"]                # (out_dim,)

    C_enc, C_in = w2.shape
    S = H * W
    N = wm.shape[0]

    # enc1: taps flattened as (kh, kw, ci) -> column t*C_in + ci
    cw1 = jnp.transpose(w1, (0, 2, 3, 1)).reshape(C_enc, 9 * C_in)
    # enc2: a "3x3 conv" that only uses the centre tap (t == 4)
    cw2 = jnp.zeros((C_enc, 9 * C_in), jnp.float32).at[:, 4 * C_in:5 * C_in].set(w2)
    conv_w = jnp.concatenate([cw1, cw2], axis=0).reshape(2 * C_enc, 1, 9 * C_in)
    conv_b = jnp.concatenate([b1, b2], axis=0).astype(jnp.float32)        # (2*C_enc,)

    # border-validity masks for the 9 taps over the flattened spatial axis
    s = jnp.arange(S)
    hh, ww = s // W, s % W
    masks = []
    for dy in (-1, 0, 1):
        for dx in (-1, 0, 1):
            ok = (hh + dy >= 0) & (hh + dy < H) & (ww + dx >= 0) & (ww + dx < W)
            masks.append(ok)
    tap_mask = jnp.stack(masks, axis=0).astype(jnp.float32)               # (9, S)

    # meta weight: (out,in) -> (in,out) -> (2*C_enc, S, out). The NCHW flatten order
    # of the stacked features is exactly (channel, h, w), so this reshape absorbs the
    # flatten+concat permutation. bf16: dominant HBM bytes.
    wm_arranged = jnp.transpose(wm).reshape(2 * C_enc, S, N).astype(jnp.bfloat16)
    meta_b = bm.reshape(1, N).astype(jnp.float32)

    return dict(conv_w=conv_w, conv_b=conv_b, tap_mask=tap_mask,
                wm=wm_arranged, meta_b=meta_b)


# ----------------------------------------------------------------------------
# StackedEncoder forward (single fused pallas_call).
# ----------------------------------------------------------------------------
def stacked_encoder_forward(x_nchw, prep, *, feature_size, height, width):
    B, C_in, H, W = x_nchw.shape
    S = H * W

    conv_w = prep["conv_w"]              # (2*C_enc, 1, 9*C_in) f32
    conv_b = prep["conv_b"]              # (2*C_enc,) f32
    tap_mask = prep["tap_mask"]          # (9, S) f32
    wm = prep["wm"]                      # (2*C_enc, S, N) bf16
    meta_b = prep["meta_b"]              # (1, N) f32

    K_ch = conv_w.shape[0]               # 2 * C_enc  (reduction axis)
    N = wm.shape[-1]
    tn = 128 if N % 128 == 0 else N      # lane-dense output tile
    n_tiles = N // tn

    x_flat = x_nchw.reshape(B, C_in, S).astype(jnp.float32)   # free reshape, no copy

    taps = tuple((dy, dx) for dy in (-1, 0, 1) for dx in (-1, 0, 1))
    kernel = functools.partial(_fused_kernel, B=B, C_in=C_in, W=W, taps=taps)

    out2d = pl.pallas_call(
        kernel,
        out_shape=jax.ShapeDtypeStruct((B, N), jnp.float32),
        grid_spec=pltpu.PrefetchScalarGridSpec(
            num_scalar_prefetch=0,
            grid=(n_tiles, K_ch),
            in_specs=[
                # input image, resident across the whole grid (constant block index)
                pl.BlockSpec((B, C_in, S), lambda n, k: (0, 0, 0)),
                # 3x3 border masks, resident
                pl.BlockSpec((9, S), lambda n, k: (0, 0)),
                # per-channel conv weights (channel k)
                pl.BlockSpec((1, 1, 9 * C_in), lambda n, k: (k, 0, 0)),
                # per-channel conv bias, scalar table in SMEM
                pl.BlockSpec(memory_space=pltpu.MemorySpace.SMEM),
                # meta weight slab for channel k / output tile n (streamed, double-buffered)
                pl.BlockSpec((1, S, tn), lambda n, k: (k, 0, n)),
                # meta bias tile
                pl.BlockSpec((1, tn), lambda n, k: (0, n)),
            ],
            out_specs=pl.BlockSpec((B, tn), lambda n, k: (0, n)),
            scratch_shapes=[
                pltpu.VMEM((B, 9 * C_in, S), jnp.float32),    # in-VMEM im2col
                pltpu.VMEM((B, tn), jnp.float32),             # f32 accumulator
            ],
        ),
        compiler_params=pltpu.CompilerParams(
            dimension_semantics=("parallel", "arbitrary"),
            vmem_limit_bytes=32 * 1024 * 1024,
        ),
    )(x_flat, tap_mask, conv_w, conv_b, wm, meta_b)

    out = out2d.reshape(B, feature_size, height, width)
    return out[:, None, :, :, :]          # (B, 1, feature_size, height, width)


# ----------------------------------------------------------------------------
# Deterministic params + pure-JAX reference + run.
# ----------------------------------------------------------------------------
def make_params(key, c_in, c_enc, h, w, feature_size, out_h, out_w):
    k1, k2, k3, k4, k5, k6 = jax.random.split(key, 6)
    in_dim = 2 * c_enc * h * w
    out_dim = feature_size * out_h * out_w
    return {
        "enc1_w": 0.1 * jax.random.normal(k1, (c_enc, c_in, 3, 3), jnp.float32),
        "enc1_b": 0.1 * jax.random.normal(k2, (c_enc,), jnp.float32),
        "enc2_w": 0.1 * jax.random.normal(k3, (c_enc, c_in), jnp.float32),
        "enc2_b": 0.1 * jax.random.normal(k4, (c_enc,), jnp.float32),
        "meta_w": 0.05 * jax.random.normal(k5, (out_dim, in_dim), jnp.float32),
        "meta_b": 0.05 * jax.random.normal(k6, (out_dim,), jnp.float32),
    }


def reference_forward(x, params, *, feature_size, height, width):
    """Pure-JAX f32 reference with the exact PyTorch module semantics."""
    w1, b1 = params["enc1_w"], params["enc1_b"]
    w2, b2 = params["enc2_w"], params["enc2_b"]
    wm, bm = params["meta_w"], params["meta_b"]
    B = x.shape[0]
    dn = ("NCHW", "OIHW", "NCHW")
    f1 = jax.lax.conv_general_dilated(x, w1, (1, 1), "SAME", dimension_numbers=dn)
    f1 = jax.nn.relu(f1 + b1[None, :, None, None])
    f2 = jax.lax.conv_general_dilated(x, w2[:, :, None, None], (1, 1), "SAME",
                                      dimension_numbers=dn)
    f2 = jax.nn.relu(f2 + b2[None, :, None, None])
    stacked = jnp.concatenate([f1.reshape(B, -1), f2.reshape(B, -1)], axis=1)
    final = stacked @ wm.T + bm
    return final.reshape(B, feature_size, height, width)[:, None]


if __name__ == "__main__":
    B, C_in, H, W = 2, 4, 16, 16
    C_enc = 8
    feature_size, out_h, out_w = 4, 8, 8

    key = jax.random.PRNGKey(0)
    kx, kp = jax.random.split(key)
    x = jax.random.normal(kx, (B, C_in, H, W), jnp.float32)     # NCHW input
    params = make_params(kp, C_in, C_enc, H, W, feature_size, out_h, out_w)

    prepared = prepare_params(params, H, W)                     # one-time, outside jit

    fwd = jax.jit(functools.partial(
        stacked_encoder_forward,
        feature_size=feature_size, height=out_h, width=out_w))
    out = fwd(x, prepared)
    jax.block_until_ready(out)

    assert out.shape == (B, 1, feature_size, out_h, out_w), out.shape
    assert out.dtype == jnp.float32

    ref = reference_forward(x, params, feature_size=feature_size,
                            height=out_h, width=out_w)
    np.testing.assert_allclose(np.asarray(out), np.asarray(ref),
                               rtol=5e-2, atol=1e-1)            # bf16 meta path tolerance

    print("KERNEL_OK")
</pallas_src>

<mosaic_0001>
module attributes {stable_mosaic.version = 11 : i64} {
  func.func @_fused_kernel(%arg0: i32, %arg1: i32, %arg2: memref<2x4x256xf32, #tpu.memory_space<vmem>>, %arg3: memref<9x256xf32, #tpu.memory_space<vmem>>, %arg4: memref<1x1x36xf32, #tpu.memory_space<vmem>>, %arg5: memref<16xf32, #tpu.memory_space<smem>>, %arg6: memref<1x256x128xbf16, #tpu.memory_space<vmem>>, %arg7: memref<1x128xf32, #tpu.memory_space<vmem>>, %arg8: memref<2x128xf32, #tpu.memory_space<vmem>>, %arg9: memref<2x36x256xf32, #tpu.memory_space<vmem>>, %arg10: memref<2x128xf32, #tpu.memory_space<vmem>>) attributes {dimension_semantics = [#tpu.dimension_semantics<parallel>, #tpu.dimension_semantics<arbitrary>], iteration_bounds = array<i64: 2, 16>, scalar_prefetch = 0 : i64, scratch_operands = 2 : i64, tpu.core_type = #tpu.core_type<tc>, window_params = [{pipeline_mode = #tpu.pipeline_mode<synchronous>, transform_indices = @transform_0, window_bounds = array<i64: 2, 4, 256>}, {pipeline_mode = #tpu.pipeline_mode<synchronous>, transform_indices = @transform_1, window_bounds = array<i64: 9, 256>}, {transform_indices = @transform_2, window_bounds = array<i64: 1, 1, 36>}, {transform_indices = @transform_3, window_bounds = array<i64: 16>}, {transform_indices = @transform_4, window_bounds = array<i64: 1, 256, 128>}, {transform_indices = @transform_5, window_bounds = array<i64: 1, 128>}, {transform_indices = @transform_6, window_bounds = array<i64: 2, 128>}]} {
    %c0_i32 = arith.constant 0 : i32
    %0 = arith.cmpi eq, %arg1, %c0_i32 : i32
    %1 = arith.extui %0 : i1 to i32
    %c0_i32_0 = arith.constant 0 : i32
    %2 = arith.cmpi ne, %1, %c0_i32_0 : i32
    scf.if %2 {
      %cst_25 = arith.constant 0.000000e+00 : f32
      %36 = vector.broadcast %cst_25 : f32 to vector<2x128xf32>
      %c0_26 = arith.constant 0 : index
      %c0_27 = arith.constant 0 : index
      %37 = vector.load %arg10[%c0_26, %c0_27] : memref<2x128xf32, #tpu.memory_space<vmem>>, vector<2x128xf32>
      tpu.vector_store %arg10[%c0_26, %c0_27], %36 {strides = array<i32>} : memref<2x128xf32, #tpu.memory_space<vmem>>, vector<2x128xf32>,
      %c0_28 = arith.constant 0 : index
      %c0_29 = arith.constant 0 : index
      %c0_30 = arith.constant 0 : index
      %38 = vector.load %arg2[%c0_28, %c0_29, %c0_30] : memref<2x4x256xf32, #tpu.memory_space<vmem>>, vector<1x4x256xf32>
      %39 = vector.shape_cast %38 : vector<1x4x256xf32> to vector<4x256xf32>
      %c17_i32 = arith.constant 17 : i32
      %40 = tpu.dynamic_rotate %39 by %c17_i32 dim 1 : vector<4x256xf32>, i32 -> vector<4x256xf32>
      %c0_31 = arith.constant 0 : index
      %c0_32 = arith.constant 0 : index
      %41 = vector.load %arg3[%c0_31, %c0_32] : memref<9x256xf32, #tpu.memory_space<vmem>>, vector<1x256xf32>
      %42 = vector.broadcast %41 : vector<1x256xf32> to vector<4x256xf32>
      %43 = arith.mulf %40, %42 : vector<4x256xf32>
      %c0_33 = arith.constant 0 : index
      %c0_34 = arith.constant 0 : index
      %c0_35 = arith.constant 0 : index
      %44 = vector.load %arg9[%c0_33, %c0_34, %c0_35] : memref<2x36x256xf32, #tpu.memory_space<vmem>>, vector<1x4x256xf32>
      %45 = vector.shape_cast %44 : vector<1x4x256xf32> to vector<4x256xf32>
      %46 = vector.shape_cast %43 : vector<4x256xf32> to vector<1x4x256xf32>
      tpu.vector_store %arg9[%c0_33, %c0_34, %c0_35], %46 {strides = array<i32>} : memref<2x36x256xf32, #tpu.memory_space<vmem>>, vector<1x4x256xf32>,
      %c16_i32 = arith.constant 16 : i32
      %47 = tpu.dynamic_rotate %39 by %c16_i32 dim 1 : vector<4x256xf32>, i32 -> vector<4x256xf32>
      %c1_36 = arith.constant 1 : index
      %c0_37 = arith.constant 0 : index
      %48 = vector.load %arg3[%c1_36, %c0_37] : memref<9x256xf32, #tpu.memory_space<vmem>>, vector<1x256xf32>
      %49 = vector.broadcast %48 : vector<1x256xf32> to vector<4x256xf32>
      %50 = arith.mulf %47, %49 : vector<4x256xf32>
      %c0_38 = arith.constant 0 : index
      %c4 = arith.constant 4 : index
      %c0_39 = arith.constant 0 : index
      %51 = vector.load %arg9[%c0_38, %c4, %c0_39] : memref<2x36x256xf32, #tpu.memory_space<vmem>>, vector<1x4x256xf32>
      %52 = vector.shape_cast %51 : vector<1x4x256xf32> to vector<4x256xf32>
      %53 = vector.shape_cast %50 : vector<4x256xf32> to vector<1x4x256xf32>
      tpu.vector_store %arg9[%c0_38, %c4, %c0_39], %53 {strides = array<i32>} : memref<2x36x256xf32, #tpu.memory_space<vmem>>, vector<1x4x256xf32>,
      %c15_i32_40 = arith.constant 15 : i32
      %54 = tpu.dynamic_rotate %39 by %c15_i32_40 dim 1 : vector<4x256xf32>, i32 -> vector<4x256xf32>
      %c2 = arith.constant 2 : index
      %c0_41 = arith.constant 0 : index
      %55 = vector.load %arg3[%c2, %c0_41] : memref<9x256xf32, #tpu.memory_space<vmem>>, vector<1x256xf32>
      %56 = vector.broadcast %55 : vector<1x256xf32> to vector<4x256xf32>
      %57 = arith.mulf %54, %56 : vector<4x256xf32>
      %c0_42 = arith.constant 0 : index
      %c8 = arith.constant 8 : index
      %c0_43 = arith.constant 0 : index
      %58 = vector.load %arg9[%c0_42, %c8, %c0_43] : memref<2x36x256xf32, #tpu.memory_space<vmem>>, vector<1x4x256xf32>
      %59 = vector.shape_cast %58 : vector<1x4x256xf32> to vector<4x256xf32>
      %60 = vector.shape_cast %57 : vector<4x256xf32> to vector<1x4x256xf32>
      tpu.vector_store %arg9[%c0_42, %c8, %c0_43], %60 {strides = array<i32>} : memref<2x36x256xf32, #tpu.memory_space<vmem>>, vector<1x4x256xf32>,
      %c1_i32 = arith.constant 1 : i32
      %61 = tpu.dynamic_rotate %39 by %c1_i32 dim 1 : vector<4x256xf32>, i32 -> vector<4x256xf32>
      %c3 = arith.constant 3 : index
      %c0_44 = arith.constant 0 : index
      %62 = vector.load %arg3[%c3, %c0_44] : memref<9x256xf32, #tpu.memory_space<vmem>>, vector<1x256xf32>
      %63 = vector.broadcast %62 : vector<1x256xf32> to vector<4x256xf32>
      %64 = arith.mulf %61, %63 : vector<4x256xf32>
      %c0_45 = arith.constant 0 : index
      %c12 = arith.constant 12 : index
      %c0_46 = arith.constant 0 : index
      %65 = vector.load %arg9[%c0_45, %c12, %c0_46] : memref<2x36x256xf32, #tpu.memory_space<vmem>>, vector<1x4x256xf32>
      %66 = vector.shape_cast %65 : vector<1x4x256xf32> to vector<4x256xf32>
      %67 = vector.shape_cast %64 : vector<4x256xf32> to vector<1x4x256xf32>
      tpu.vector_store %arg9[%c0_45, %c12, %c0_46], %67 {strides = array<i32>} : memref<2x36x256xf32, #tpu.memory_space<vmem>>, vector<1x4x256xf32>,
      %c4_47 = arith.constant 4 : index
      %c0_48 = arith.constant 0 : index
      %68 = vector.load %arg3[%c4_47, %c0_48] : memref<9x256xf32, #tpu.memory_space<vmem>>, vector<1x256xf32>
      %69 = vector.broadcast %68 : vector<1x256xf32> to vector<4x256xf32>
      %70 = arith.mulf %39, %69 : vector<4x256xf32>
      %c0_49 = arith.constant 0 : index
      %c16 = arith.constant 16 : index
      %c0_50 = arith.constant 0 : index
      %71 = vector.load %arg9[%c0_49, %c16, %c0_50] : memref<2x36x256xf32, #tpu.memory_space<vmem>>, vector<1x4x256xf32>
      %72 = vector.shape_cast %71 : vector<1x4x256xf32> to vector<4x256xf32>
      %73 = vector.shape_cast %70 : vector<4x256xf32> to vector<1x4x256xf32>
      tpu.vector_store %arg9[%c0_49, %c16, %c0_50], %73 {strides = array<i32>} : memref<2x36x256xf32, #tpu.memory_space<vmem>>, vector<1x4x256xf32>,
      %c255_i32 = arith.constant 255 : i32
      %74 = tpu.dynamic_rotate %39 by %c255_i32 dim 1 : vector<4x256xf32>, i32 -> vector<4x256xf32>
      %c5 = arith.constant 5 : index
      %c0_51 = arith.constant 0 : index
      %75 = vector.load %arg3[%c5, %c0_51] : memref<9x256xf32, #tpu.memory_space<vmem>>, vector<1x256xf32>
      %76 = vector.broadcast %75 : vector<1x256xf32> to vector<4x256xf32>
      %77 = arith.mulf %74, %76 : vector<4x256xf32>
      %c0_52 = arith.constant 0 : index
      %c20 = arith.constant 20 : index
      %c0_53 = arith.constant 0 : index
      %78 = vector.load %arg9[%c0_52, %c20, %c0_53] : memref<2x36x256xf32, #tpu.memory_space<vmem>>, vector<1x4x256xf32>
      %79 = vector.shape_cast %78 : vector<1x4x256xf32> to vector<4x256xf32>
      %80 = vector.shape_cast %77 : vector<4x256xf32> to vector<1x4x256xf32>
      tpu.vector_store %arg9[%c0_52, %c20, %c0_53], %80 {strides = array<i32>} : memref<2x36x256xf32, #tpu.memory_space<vmem>>, vector<1x4x256xf32>,
      %c241_i32 = arith.constant 241 : i32
      %81 = tpu.dynamic_rotate %39 by %c241_i32 dim 1 : vector<4x256xf32>, i32 -> vector<4x256xf32>
      %c6 = arith.constant 6 : index
      %c0_54 = arith.constant 0 : index
      %82 = vector.load %arg3[%c6, %c0_54] : memref<9x256xf32, #tpu.memory_space<vmem>>, vector<1x256xf32>
      %83 = vector.broadcast %82 : vector<1x256xf32> to vector<4x256xf32>
      %84 = arith.mulf %81, %83 : vector<4x256xf32>
      %c0_55 = arith.constant 0 : index
      %c24 = arith.constant 24 : index
      %c0_56 = arith.constant 0 : index
      %85 = vector.load %arg9[%c0_55, %c24, %c0_56] : memref<2x36x256xf32, #tpu.memory_space<vmem>>, vector<1x4x256xf32>
      %86 = vector.shape_cast %85 : vector<1x4x256xf32> to vector<4x256xf32>
      %87 = vector.shape_cast %84 : vector<4x256xf32> to vector<1x4x256xf32>
      tpu.vector_store %arg9[%c0_55, %c24, %c0_56], %87 {strides = array<i32>} : memref<2x36x256xf32, #tpu.memory_space<vmem>>, vector<1x4x256xf32>,
      %c240_i32 = arith.constant 240 : i32
      %88 = tpu.dynamic_rotate %39 by %c240_i32 dim 1 : vector<4x256xf32>, i32 -> vector<4x256xf32>
      %c7 = arith.constant 7 : index
      %c0_57 = arith.constant 0 : index
      %89 = vector.load %arg3[%c7, %c0_57] : memref<9x256xf32, #tpu.memory_space<vmem>>, vector<1x256xf32>
      %90 = vector.broadcast %89 : vector<1x256xf32> to vector<4x256xf32>
      %91 = arith.mulf %88, %90 : vector<4x256xf32>
      %c0_58 = arith.constant 0 : index
      %c28 = arith.constant 28 : index
      %c0_59 = arith.constant 0 : index
      %92 = vector.load %arg9[%c0_58, %c28, %c0_59] : memref<2x36x256xf32, #tpu.memory_space<vmem>>, vector<1x4x256xf32>
      %93 = vector.shape_cast %92 : vector<1x4x256xf32> to vector<4x256xf32>
      %94 = vector.shape_cast %91 : vector<4x256xf32> to vector<1x4x256xf32>
      tpu.vector_store %arg9[%c0_58, %c28, %c0_59], %94 {strides = array<i32>} : memref<2x36x256xf32, #tpu.memory_space<vmem>>, vector<1x4x256xf32>,
      %c239_i32 = arith.constant 239 : i32
      %95 = tpu.dynamic_rotate %39 by %c239_i32 dim 1 : vector<4x256xf32>, i32 -> vector<4x256xf32>
      %c8_60 = arith.constant 8 : index
      %c0_61 = arith.constant 0 : index
      %96 = vector.load %arg3[%c8_60, %c0_61] : memref<9x256xf32, #tpu.memory_space<vmem>>, vector<1x256xf32>
      %97 = vector.broadcast %96 : vector<1x256xf32> to vector<4x256xf32>
      %98 = arith.mulf %95, %97 : vector<4x256xf32>
      %c0_62 = arith.constant 0 : index
      %c32 = arith.constant 32 : index
      %c0_63 = arith.constant 0 : index
      %99 = vector.load %arg9[%c0_62, %c32, %c0_63] : memref<2x36x256xf32, #tpu.memory_space<vmem>>, vector<1x4x256xf32>
      %100 = vector.shape_cast %99 : vector<1x4x256xf32> to vector<4x256xf32>
      %101 = vector.shape_cast %98 : vector<4x256xf32> to vector<1x4x256xf32>
      tpu.vector_store %arg9[%c0_62, %c32, %c0_63], %101 {strides = array<i32>} : memref<2x36x256xf32, #tpu.memory_space<vmem>>, vector<1x4x256xf32>,
      %c1_64 = arith.constant 1 : index
      %c0_65 = arith.constant 0 : index
      %c0_66 = arith.constant 0 : index
      %102 = vector.load %arg2[%c1_64, %c0_65, %c0_66] : memref<2x4x256xf32, #tpu.memory_space<vmem>>, vector<1x4x256xf32>
      %103 = vector.shape_cast %102 : vector<1x4x256xf32> to vector<4x256xf32>
      %c17_i32_67 = arith.constant 17 : i32
      %104 = tpu.dynamic_rotate %103 by %c17_i32_67 dim 1 : vector<4x256xf32>, i32 -> vector<4x256xf32>
      %c0_68 = arith.constant 0 : index
      %c0_69 = arith.constant 0 : index
      %105 = vector.load %arg3[%c0_68, %c0_69] : memref<9x256xf32, #tpu.memory_space<vmem>>, vector<1x256xf32>
      %106 = vector.broadcast %105 : vector<1x256xf32> to vector<4x256xf32>
      %107 = arith.mulf %104, %106 : vector<4x256xf32>
      %c1_70 = arith.constant 1 : index
      %c0_71 = arith.constant 0 : index
      %c0_72 = arith.constant 0 : index
      %108 = vector.load %arg9[%c1_70, %c0_71, %c0_72] : memref<2x36x256xf32, #tpu.memory_space<vmem>>, vector<1x4x256xf32>
      %109 = vector.shape_cast %108 : vector<1x4x256xf32> to vector<4x256xf32>
      %110 = vector.shape_cast %107 : vector<4x256xf32> to vector<1x4x256xf32>
      tpu.vector_store %arg9[%c1_70, %c0_71, %c0_72], %110 {strides = array<i32>} : memref<2x36x256xf32, #tpu.memory_space<vmem>>, vector<1x4x256xf32>,
      %c16_i32_73 = arith.constant 16 : i32
      %111 = tpu.dynamic_rotate %103 by %c16_i32_73 dim 1 : vector<4x256xf32>, i32 -> vector<4x256xf32>
      %c1_74 = arith.constant 1 : index
      %c0_75 = arith.constant 0 : index
      %112 = vector.load %arg3[%c1_74, %c0_75] : memref<9x256xf32, #tpu.memory_space<vmem>>, vector<1x256xf32>
      %113 = vector.broadcast %112 : vector<1x256xf32> to vector<4x256xf32>
      %114 = arith.mulf %111, %113 : vector<4x256xf32>
      %c1_76 = arith.constant 1 : index
      %c4_77 = arith.constant 4 : index
      %c0_78 = arith.constant 0 : index
      %115 = vector.load %arg9[%c1_76, %c4_77, %c0_78] : memref<2x36x256xf32, #tpu.memory_space<vmem>>, vector<1x4x256xf32>
      %116 = vector.shape_cast %115 : vector<1x4x256xf32> to vector<4x256xf32>
      %117 = vector.shape_cast %114 : vector<4x256xf32> to vector<1x4x256xf32>
      tpu.vector_store %arg9[%c1_76, %c4_77, %c0_78], %117 {strides = array<i32>} : memref<2x36x256xf32, #tpu.memory_space<vmem>>, vector<1x4x256xf32>,
      %c15_i32_79 = arith.constant 15 : i32
      %118 = tpu.dynamic_rotate %103 by %c15_i32_79 dim 1 : vector<4x256xf32>, i32 -> vector<4x256xf32>
      %c2_80 = arith.constant 2 : index
      %c0_81 = arith.constant 0 : index
      %119 = vector.load %arg3[%c2_80, %c0_81] : memref<9x256xf32, #tpu.memory_space<vmem>>, vector<1x256xf32>
      %120 = vector.broadcast %119 : vector<1x256xf32> to vector<4x256xf32>
      %121 = arith.mulf %118, %120 : vector<4x256xf32>
      %c1_82 = arith.constant 1 : index
      %c8_83 = arith.constant 8 : index
      %c0_84 = arith.constant 0 : index
      %122 = vector.load %arg9[%c1_82, %c8_83, %c0_84] : memref<2x36x256xf32, #tpu.memory_space<vmem>>, vector<1x4x256xf32>
      %123 = vector.shape_cast %122 : vector<1x4x256xf32> to vector<4x256xf32>
      %124 = vector.shape_cast %121 : vector<4x256xf32> to vector<1x4x256xf32>
      tpu.vector_store %arg9[%c1_82, %c8_83, %c0_84], %124 {strides = array<i32>} : memref<2x36x256xf32, #tpu.memory_space<vmem>>, vector<1x4x256xf32>,
      %c1_i32_85 = arith.constant 1 : i32
      %125 = tpu.dynamic_rotate %103 by %c1_i32_85 dim 1 : vector<4x256xf32>, i32 -> vector<4x256xf32>
      %c3_86 = arith.constant 3 : index
      %c0_87 = arith.constant 0 : index
      %126 = vector.load %arg3[%c3_86, %c0_87] : memref<9x256xf32, #tpu.memory_space<vmem>>, vector<1x256xf32>
      %127 = vector.broadcast %126 : vector<1x256xf32> to vector<4x256xf32>
      %128 = arith.mulf %125, %127 : vector<4x256xf32>
      %c1_88 = arith.constant 1 : index
      %c12_89 = arith.constant 12 : index
      %c0_90 = arith.constant 0 : index
      %129 = vector.load %arg9[%c1_88, %c12_89, %c0_90] : memref<2x36x256xf32, #tpu.memory_space<vmem>>, vector<1x4x256xf32>
      %130 = vector.shape_cast %129 : vector<1x4x256xf32> to vector<4x256xf32>
      %131 = vector.shape_cast %128 : vector<4x256xf32> to vector<1x4x256xf32>
      tpu.vector_store %arg9[%c1_88, %c12_89, %c0_90], %131 {strides = array<i32>} : memref<2x36x256xf32, #tpu.memory_space<vmem>>, vector<1x4x256xf32>,
      %c4_91 = arith.constant 4 : index
      %c0_92 = arith.constant 0 : index
      %132 = vector.load %arg3[%c4_91, %c0_92] : memref<9x256xf32, #tpu.memory_space<vmem>>, vector<1x256xf32>
      %133 = vector.broadcast %132 : vector<1x256xf32> to vector<4x256xf32>
      %134 = arith.mulf %103, %133 : vector<4x256xf32>
      %c1_93 = arith.constant 1 : index
      %c16_94 = arith.constant 16 : index
      %c0_95 = arith.constant 0 : index
      %135 = vector.load %arg9[%c1_93, %c16_94, %c0_95] : memref<2x36x256xf32, #tpu.memory_space<vmem>>, vector<1x4x256xf32>
      %136 = vector.shape_cast %135 : vector<1x4x256xf32> to vector<4x256xf32>
      %137 = vector.shape_cast %134 : vector<4x256xf32> to vector<1x4x256xf32>
      tpu.vector_store %arg9[%c1_93, %c16_94, %c0_95], %137 {strides = array<i32>} : memref<2x36x256xf32, #tpu.memory_space<vmem>>, vector<1x4x256xf32>,
      %c255_i32_96 = arith.constant 255 : i32
      %138 = tpu.dynamic_rotate %103 by %c255_i32_96 dim 1 : vector<4x256xf32>, i32 -> vector<4x256xf32>
      %c5_97 = arith.constant 5 : index
      %c0_98 = arith.constant 0 : index
      %139 = vector.load %arg3[%c5_97, %c0_98] : memref<9x256xf32, #tpu.memory_space<vmem>>, vector<1x256xf32>
      %140 = vector.broadcast %139 : vector<1x256xf32> to vector<4x256xf32>
      %141 = arith.mulf %138, %140 : vector<4x256xf32>
      %c1_99 = arith.constant 1 : index
      %c20_100 = arith.constant 20 : index
      %c0_101 = arith.constant 0 : index
      %142 = vector.load %arg9[%c1_99, %c20_100, %c0_101] : memref<2x36x256xf32, #tpu.memory_space<vmem>>, vector<1x4x256xf32>
      %143 = vector.shape_cast %142 : vector<1x4x256xf32> to vector<4x256xf32>
      %144 = vector.shape_cast %141 : vector<4x256xf32> to vector<1x4x256xf32>
      tpu.vector_store %arg9[%c1_99, %c20_100, %c0_101], %144 {strides = array<i32>} : memref<2x36x256xf32, #tpu.memory_space<vmem>>, vector<1x4x256xf32>,
      %c241_i32_102 = arith.constant 241 : i32
      %145 = tpu.dynamic_rotate %103 by %c241_i32_102 dim 1 : vector<4x256xf32>, i32 -> vector<4x256xf32>
      %c6_103 = arith.constant 6 : index
      %c0_104 = arith.constant 0 : index
      %146 = vector.load %arg3[%c6_103, %c0_104] : memref<9x256xf32, #tpu.memory_space<vmem>>, vector<1x256xf32>
      %147 = vector.broadcast %146 : vector<1x256xf32> to vector<4x256xf32>
      %148 = arith.mulf %145, %147 : vector<4x256xf32>
      %c1_105 = arith.constant 1 : index
      %c24_106 = arith.constant 24 : index
      %c0_107 = arith.constant 0 : index
      %149 = vector.load %arg9[%c1_105, %c24_106, %c0_107] : memref<2x36x256xf32, #tpu.memory_space<vmem>>, vector<1x4x256xf32>
      %150 = vector.shape_cast %149 : vector<1x4x256xf32> to vector<4x256xf32>
      %151 = vector.shape_cast %148 : vector<4x256xf32> to vector<1x4x256xf32>
      tpu.vector_store %arg9[%c1_105, %c24_106, %c0_107], %151 {strides = array<i32>} : memref<2x36x256xf32, #tpu.memory_space<vmem>>, vector<1x4x256xf32>,
      %c240_i32_108 = arith.constant 240 : i32
      %152 = tpu.dynamic_rotate %103 by %c240_i32_108 dim 1 : vector<4x256xf32>, i32 -> vector<4x256xf32>
      %c7_109 = arith.constant 7 : index
      %c0_110 = arith.constant 0 : index
      %153 = vector.load %arg3[%c7_109, %c0_110] : memref<9x256xf32, #tpu.memory_space<vmem>>, vector<1x256xf32>
      %154 = vector.broadcast %153 : vector<1x256xf32> to vector<4x256xf32>
      %155 = arith.mulf %152, %154 : vector<4x256xf32>
      %c1_111 = arith.constant 1 : index
      %c28_112 = arith.constant 28 : index
      %c0_113 = arith.constant 0 : index
      %156 = vector.load %arg9[%c1_111, %c28_112, %c0_113] : memref<2x36x256xf32, #tpu.memory_space<vmem>>, vector<1x4x256xf32>
      %157 = vector.shape_cast %156 : vector<1x4x256xf32> to vector<4x256xf32>
      %158 = vector.shape_cast %155 : vector<4x256xf32> to vector<1x4x256xf32>
      tpu.vector_store %arg9[%c1_111, %c28_112, %c0_113], %158 {strides = array<i32>} : memref<2x36x256xf32, #tpu.memory_space<vmem>>, vector<1x4x256xf32>,
      %c239_i32_114 = arith.constant 239 : i32
      %159 = tpu.dynamic_rotate %103 by %c239_i32_114 dim 1 : vector<4x256xf32>, i32 -> vector<4x256xf32>
      %c8_115 = arith.constant 8 : index
      %c0_116 = arith.constant 0 : index
      %160 = vector.load %arg3[%c8_115, %c0_116] : memref<9x256xf32, #tpu.memory_space<vmem>>, vector<1x256xf32>
      %161 = vector.broadcast %160 : vector<1x256xf32> to vector<4x256xf32>
      %162 = arith.mulf %159, %161 : vector<4x256xf32>
      %c1_117 = arith.constant 1 : index
      %c32_118 = arith.constant 32 : index
      %c0_119 = arith.constant 0 : index
      %163 = vector.load %arg9[%c1_117, %c32_118, %c0_119] : memref<2x36x256xf32, #tpu.memory_space<vmem>>, vector<1x4x256xf32>
      %164 = vector.shape_cast %163 : vector<1x4x256xf32> to vector<4x256xf32>
      %165 = vector.shape_cast %162 : vector<4x256xf32> to vector<1x4x256xf32>
      tpu.vector_store %arg9[%c1_117, %c32_118, %c0_119], %165 {strides = array<i32>} : memref<2x36x256xf32, #tpu.memory_space<vmem>>, vector<1x4x256xf32>,
    } else {
    }
    %c0 = arith.constant 0 : index
    %c0_1 = arith.constant 0 : index
    %c0_2 = arith.constant 0 : index
    %3 = vector.load %arg4[%c0, %c0_1, %c0_2] : memref<1x1x36xf32, #tpu.memory_space<vmem>>, vector<1x1x36xf32>
    %4 = vector.shape_cast %3 : vector<1x1x36xf32> to vector<1x36xf32>
    %5 = arith.index_cast %arg1 : i32 to index
    %6 = memref.load %arg5[%5] : memref<16xf32, #tpu.memory_space<smem>>
    %c0_3 = arith.constant 0 : index
    %c0_4 = arith.constant 0 : index
    %c0_5 = arith.constant 0 : index
    %7 = vector.load %arg6[%c0_3, %c0_4, %c0_5] : memref<1x256x128xbf16, #tpu.memory_space<vmem>>, vector<1x256x128xbf16>
    %8 = vector.shape_cast %7 : vector<1x256x128xbf16> to vector<256x128xbf16>
    %c0_6 = arith.constant 0 : index
    %c0_7 = arith.constant 0 : index
    %c0_8 = arith.constant 0 : index
    %9 = vector.load %arg9[%c0_6, %c0_7, %c0_8] : memref<2x36x256xf32, #tpu.memory_space<vmem>>, vector<1x36x256xf32>
    %10 = vector.shape_cast %9 : vector<1x36x256xf32> to vector<36x256xf32>
    %cst = arith.constant dense<0.000000e+00> : vector<1x256xf32>
    %11 = tpu.matmul %4, %10, %cst {dimension_numbers = #tpu.dot_dimension_numbers<[1], [0], [0], [1], [0, 0, 1, 1], [], []>} : vector<1x36xf32>, vector<36x256xf32>, vector<1x256xf32> -> vector<1x256xf32>
    %12 = vector.broadcast %6 : f32 to vector<1x256xf32>
    %13 = arith.addf %11, %12 : vector<1x256xf32>
    %cst_9 = arith.constant 0.000000e+00 : f32
    %14 = vector.broadcast %cst_9 : f32 to vector<1x256xf32>
    %15 = arith.maximumf %13, %14 : vector<1x256xf32>
    %16 = arith.truncf %15 : vector<1x256xf32> to vector<1x256xbf16>
    %c0_10 = arith.constant 0 : index
    %c0_11 = arith.constant 0 : index
    %17 = vector.load %arg10[%c0_10, %c0_11] : memref<2x128xf32, #tpu.memory_space<vmem>>, vector<1x128xf32>
    %cst_12 = arith.constant dense<0.000000e+00> : vector<1x128xf32>
    %18 = tpu.matmul %16, %8, %cst_12 {dimension_numbers = #tpu.dot_dimension_numbers<[1], [0], [0], [1], [0, 0, 1, 1], [], []>} : vector<1x256xbf16>, vector<256x128xbf16>, vector<1x128xf32> -> vector<1x128xf32>
    %19 = arith.addf %17, %18 : vector<1x128xf32>
    %c0_13 = arith.constant 0 : index
    %c0_14 = arith.constant 0 : index
    %20 = vector.load %arg10[%c0_13, %c0_14] : memref<2x128xf32, #tpu.memory_space<vmem>>, vector<1x128xf32>
    tpu.vector_store %arg10[%c0_13, %c0_14], %19 {strides = array<i32>} : memref<2x128xf32, #tpu.memory_space<vmem>>, vector<1x128xf32>,
    %c1 = arith.constant 1 : index
    %c0_15 = arith.constant 0 : index
    %c0_16 = arith.constant 0 : index
    %21 = vector.load %arg9[%c1, %c0_15, %c0_16] : memref<2x36x256xf32, #tpu.memory_space<vmem>>, vector<1x36x256xf32>
    %22 = vector.shape_cast %21 : vector<1x36x256xf32> to vector<36x256xf32>
    %cst_17 = arith.constant dense<0.000000e+00> : vector<1x256xf32>
    %23 = tpu.matmul %4, %22, %cst_17 {dimension_numbers = #tpu.dot_dimension_numbers<[1], [0], [0], [1], [0, 0, 1, 1], [], []>} : vector<1x36xf32>, vector<36x256xf32>, vector<1x256xf32> -> vector<1x256xf32>
    %24 = vector.broadcast %6 : f32 to vector<1x256xf32>
    %25 = arith.addf %23, %24 : vector<1x256xf32>
    %cst_18 = arith.constant 0.000000e+00 : f32
    %26 = vector.broadcast %cst_18 : f32 to vector<1x256xf32>
    %27 = arith.maximumf %25, %26 : vector<1x256xf32>
    %28 = arith.truncf %27 : vector<1x256xf32> to vector<1x256xbf16>
    %c1_19 = arith.constant 1 : index
    %c0_20 = arith.constant 0 : index
    %29 = vector.load %arg10[%c1_19, %c0_20] : memref<2x128xf32, #tpu.memory_space<vmem>>, vector<1x128xf32>
    %cst_21 = arith.constant dense<0.000000e+00> : vector<1x128xf32>
    %30 = tpu.matmul %28, %8, %cst_21 {dimension_numbers = #tpu.dot_dimension_numbers<[1], [0], [0], [1], [0, 0, 1, 1], [], []>} : vector<1x256xbf16>, vector<256x128xbf16>, vector<1x128xf32> -> vector<1x128xf32>
    %31 = arith.addf %29, %30 : vector<1x128xf32>
    %c1_22 = arith.constant 1 : index
    %c0_23 = arith.constant 0 : index
    %32 = vector.load %arg10[%c1_22, %c0_23] : memref<2x128xf32, #tpu.memory_space<vmem>>, vector<1x128xf32>
    tpu.vector_store %arg10[%c1_22, %c0_23], %31 {strides = array<i32>} : memref<2x128xf32, #tpu.memory_space<vmem>>, vector<1x128xf32>,
    %c15_i32 = arith.constant 15 : i32
    %33 = arith.cmpi eq, %arg1, %c15_i32 : i32
    %34 = arith.extui %33 : i1 to i32
    %c0_i32_24 = arith.constant 0 : i32
    %35 = arith.cmpi ne, %34, %c0_i32_24 : i32
    scf.if %35 {
      %c0_25 = arith.constant 0 : index
      %c0_26 = arith.constant 0 : index
      %36 = vector.load %arg10[%c0_25, %c0_26] : memref<2x128xf32, #tpu.memory_space<vmem>>, vector<2x128xf32>
      %c0_27 = arith.constant 0 : index
      %c0_28 = arith.constant 0 : index
      %37 = vector.load %arg7[%c0_27, %c0_28] : memref<1x128xf32, #tpu.memory_space<vmem>>, vector<1x128xf32>
      %38 = vector.broadcast %37 : vector<1x128xf32> to vector<2x128xf32>
      %39 = arith.addf %36, %38 : vector<2x128xf32>
      %c0_29 = arith.constant 0 : index
      %c0_30 = arith.constant 0 : index
      %40 = vector.load %arg8[%c0_29, %c0_30] : memref<2x128xf32, #tpu.memory_space<vmem>>, vector<2x128xf32>
      tpu.vector_store %arg8[%c0_29, %c0_30], %39 {strides = array<i32>} : memref<2x128xf32, #tpu.memory_space<vmem>>, vector<2x128xf32>,
    } else {
    }
    return
  }
  func.func @transform_0(%arg0: i32, %arg1: i32) -> (i32, i32, i32) {
    %c0_i32 = arith.constant 0 : i32
    %c0_i32_0 = arith.constant 0 : i32
    %c0_i32_1 = arith.constant 0 : i32
    %c0_i32_2 = arith.constant 0 : i32
    return %c0_i32, %c0_i32_0, %c0_i32_1 : i32, i32, i32
  }
  func.func @transform_1(%arg0: i32, %arg1: i32) -> (i32, i32) {
    %c0_i32 = arith.constant 0 : i32
    %c0_i32_0 = arith.constant 0 : i32
    %c0_i32_1 = arith.constant 0 : i32
    return %c0_i32, %c0_i32_0 : i32, i32
  }
  func.func @transform_2(%arg0: i32, %arg1: i32) -> (i32, i32, i32) {
    %c0_i32 = arith.constant 0 : i32
    %c0_i32_0 = arith.constant 0 : i32
    %c0_i32_1 = arith.constant 0 : i32
    return %arg1, %c0_i32, %c0_i32_0 : i32, i32, i32
  }
  func.func @transform_3(%arg0: i32, %arg1: i32) -> i32 {
    %c0_i32 = arith.constant 0 : i32
    %c0_i32_0 = arith.constant 0 : i32
    return %c0_i32 : i32
  }
  func.func @transform_4(%arg0: i32, %arg1: i32) -> (i32, i32, i32) {
    %c0_i32 = arith.constant 0 : i32
    %c0_i32_0 = arith.constant 0 : i32
    return %arg1, %c0_i32, %arg0 : i32, i32, i32
  }
  func.func @transform_5(%arg0: i32, %arg1: i32) -> (i32, i32) {
    %c0_i32 = arith.constant 0 : i32
    %c0_i32_0 = arith.constant 0 : i32
    return %c0_i32, %arg0 : i32, i32
  }
  func.func @transform_6(%arg0: i32, %arg1: i32) -> (i32, i32) {
    %c0_i32 = arith.constant 0 : i32
    %c0_i32_0 = arith.constant 0 : i32
    return %c0_i32, %arg0 : i32, i32
  }
}

</mosaic_0001>

<bundles_post_ra>
// kernel: stacked_encoder_forward.1
= control target key start
LH: loop header
LB: loop body
LE: loop exit
PB: predicated region body
PF: predicated region fallthrough
CT: control target
= control target key end

     0   :  { %s2597_s0 = inlined_call_operand.vmem [shape: f32[2,4,256], index: 0, kind: input, shape index: {}]   ;;  %s2598_s1 = inlined_call_operand.hbm [shape: f32[9,256], index: 1, kind: input, shape index: {}]   ;;  %s2599_s2 = inlined_call_operand.hbm [shape: f32[16,1,36], index: 2, kind: input, shape index: {}]   ;;  %s2600_s3 = inlined_call_operand.hbm [shape: f32[16], index: 3, kind: input, shape index: {}]   ;;  %s2601_s4 = inlined_call_operand.hbm [shape: bf16[16,256,256], index: 4, kind: input, shape index: {}]   ;;  %s2602_s5 = inlined_call_operand.hbm [shape: f32[1,256], index: 5, kind: input, shape index: {}]   ;;  %s2603_s6 = inlined_call_operand.vmem [shape: f32[2,256], index: 6, kind: output, shape index: {}]  }
   0x1   :  { %2623 = sst [smem:[#allocation29_spill]] %s2597_s0 }
   0x2   :  { %2624 = sst [smem:[#allocation30_spill]] %s2599_s2 }
   0x3   :  { %2625 = sst [smem:[#allocation31_spill]] %s2603_s6 }
   0x4   :  { %11 = vsyncpa [#allocation5], 0 }
   0x5   :  { %12 = vsyncpa [#allocation8], 0 }
   0x6   :  { %14 = vsyncpa [#allocation8 + $0x1], 0 }
   0x7   :  { %15 = vsyncpa [#allocation6], 0 }
   0x8   :  { %16 = vsyncpa [#allocation12], 0 }
   0x9   :  { %18 = vsyncpa [#allocation12 + $0x1], 0  ;;  %s2010_s21 = smov 0   ;;  %s2012_s22 = smov 0  }
   0xa   :  { %s2014_s23 = smov 0   ;;  %s2016_s24 = smov 0  }
   0xb   :  { %s2018_s25 = smov 0   ;;  %s2020_s26 = smov 0  }
   0xc   :  { %s2022_s27 = smov 0   ;;  %s2024_s28 = smov 0  }
   0xd   :  { %s2026_s29 = smov 0   ;;  %s2028_s30 = smov 0  }
   0xe   :  { %s2030_s7 = smov 0   ;;  %s2032_s8 = smov 0  }
   0xf   :  { %s2034_s9 = smov 0   ;;  %s2036_s10 = smov 0  }
  0x10 LB: > { %2626 = sst [smem:[#allocation18_spill]] %s1917_s25  ;;  %s2605_s11 = sadd.s32 4294967295, %s1953_s10   ;;  %s1953_s10 = sphi %s2036_s10, %s24_s10   ;;  %s1949_s9 = sphi %s2034_s9, %s2682_s9   ;;  %s1945_s8 = sphi %s2032_s8, %s2672_s8   ;;  %s1941_s7 = sphi %s2030_s7, %s2681_s7   ;;  %s1937_s30 = sphi %s2028_s30, %s2680_s30   ;;  %s1933_s29 = sphi %s2026_s29, %s2670_s29   ;;  %s1929_s28 = sphi %s2024_s28, %s2679_s28   ;;  %s1925_s27 = sphi %s2022_s27, %s2678_s27   ;;  %s1921_s26 = sphi %s2020_s26, %s2668_s26   ;;  %s1917_s25 = sphi %s2018_s25, %s2667_s25   ;;  %s1913_s24 = sphi %s2016_s24, %s2666_s24   ;;  %s1909_s23 = sphi %s2014_s23, %s2677_s23   ;;  %s1905_s22 = sphi %s2012_s22, %s2676_s22   ;;  %s1901_s21 = sphi %s2010_s21, %s2675_s21  }
  0x11   : > { %2627 = sst [smem:[#allocation19_spill]] %s1921_s26  ;;  %s33_s12 = sadd.s32 1, %s1945_s8 }
  0x12   : > { %2628 = sst [smem:[#allocation20_spill]] %s1933_s29  ;;  %p34_p0 = scmp.ge.s32.totalorder %s33_s12, 16 }
  0x13   : > { %2629 = sst [smem:[#allocation21_spill]] %s1937_s30  ;;  %s36_s13 = sadd.s32 1, %s1949_s9 }
  0x14   : > { %2630 = sst [smem:[#allocation22_spill]] %s1941_s7  ;;  %s85_s14 = sadd.s32 1, %s1933_s29 }
  0x15   : > { %2631 = sst [smem:[#allocation23_spill]] %s1945_s8  ;;  %p92_p1 = scmp.ne.s32.totalorder %s1933_s29, %s1929_s28 }
  0x16   : > { %s2684_s12 = smov (%p34_p0, %s33_s12), 0  ;;  %s2686_s13 = smov (!%p34_p0, %s36_s13), %s1949_s9 }
  0x17   : > { %2632 = sst [smem:[#allocation24_spill]] %s2684_s12  ;;  %s82_s15 = ssub.s32 %s1945_s8, %s2684_s12 }
  0x18   : > { %p2613_p2 = scmp.eq.s32.totalorder %s1953_s10, 0  ;;  %p38_p3 = scmp.ge.s32.totalorder %s2686_s13, 2 }
  0x19   : > { %p83_p4 = scmp.eq.s32.totalorder %s82_s15, 0  ;;  %p98_p6 = scmp.ne.s32.totalorder %s1929_s28, %s1925_s27 }
  0x1a   : > { %p2092_p5 = por %p2613_p2, %p92_p1  ;;  %s2688_s13 = smov (%p38_p3, %s2686_s13), 0 }
  0x1b   : > { %2634 = sst [smem:[#allocation25_spill]] %s2688_s13  ;;  %p2104_p7 = scmp.eq.s32.totalorder %s2605_s11, 0 }
  0x1c   : > { %s2100_s17 = scalar_select %p83_p4, %s1933_s29, %s85_s14  }
  0x1d   : > { %s2110_s19 = ssub.s32 %s1949_s9, %s2688_s13  ;;  %s134_s27 = sadd.s32 1, %s1921_s26 }
  0x1e   : > { %2635 = sst [smem:[#allocation26_spill]] %s2100_s17  ;;  %s131_s20 = sor.u32 %s2110_s19, %s82_s15 }
  0x1f   : > { %p2116_p8 = por %p2104_p7, %p98_p6  ;;  %p132_p9 = scmp.eq.s32.totalorder %s131_s20, 0 }
  0x20   : > { %p141_p10 = scmp.ne.s32.totalorder %s1921_s26, %s1917_s25  ;;  %p147_p11 = scmp.ne.s32.totalorder %s1917_s25, %s1913_s24 }
  0x21   : > { %s2637_s12 = scalar_select %p2116_p8, 1, 0 }
  0x22   : > { %s2125_s14 = scalar_select %p132_p9, %s1921_s26, %s134_s27  }
  0x23   : > { %p2129_p12 = por %p141_p10, %p2613_p2  ;;  %p2135_p13 = por %p147_p11, %p2104_p7 }
  0x24   : > { %2638 = sst [smem:[#allocation27_spill]] %s2125_s14  ;;  %p2612_p1 = scmp.lt.s32.totalorder %s1953_s10, 32 }
  0x25   : > { %s2640_s15 = scalar_select %p2135_p13, 1, 0 }
  0x26   : > { %s248_s20 = sand.u32 1, %s1953_s10   ;;  %s250_s13 = sand.u32 1, %s1933_s29  }
  0x27   : > { %2641 = sst [smem:[#allocation28_spill]] %s2640_s15  ;;  %s1411_s17 = sshll.u32 %s1945_s8, 4 }
  0x28   : > { %s251_s24 = scalar_lea.vmem [#allocation7], %s250_s13  ;;  %s2642_s2 = sld [smem:[#allocation30_spill]] }
  0x29   : > { %s258_s0 = sshll.u32 %s251_s24, 4  ;;  %p2155_p3 = pnand %p2612_p1, %p2092_p5  ;;  %s2149_s0 = int_to_ptr.vmem [resolvable:$true] %s258_s0 }
  0x2a   : > { %s1413_s13 = sshll.u32 %s1945_s8, 6  ;;  %p2167_p4 = pnand %p2612_p1, %p2129_p12 }
  0x2b   : > { %s2161_s24 = sadd.s32 %s1949_s9, %s1413_s13  ;;  %s2172_s16 = scalar_lea.sflag [#allocation8], %s248_s20 }
  0x2c   : > { %s1414_s14 = sshll.u32 %s2161_s24, 6  ;;  %p1694_p6 = pneg %p2155_p3 }
  0x2e   : > { %s2147_s30 = scalar_lea.hbm %s2642_s2, %s1411_s17  ;;  %s1697_s11 = scalar_lea.hbm %s2642_s2, 256 }
  0x2f   : > { %s2644_s17 = scalar_select %p2167_p4, 1, 0 }
  0x30   : > { %s1692_s27 = scalar_lea.hbm %s2147_s30, 16  ;;  %p1698_p11 = scmp.lt.u32.totalorder %s2147_s30, %s2642_s2 }
  0x31   : > { %p1693_p5 = scmp.ne.s32.totalorder %s2147_s30, %s1692_s27  ;;  %p1699_p12 = scmp.lt.u32.totalorder %s1697_s11, %s1692_s27 }
  0x32   : > { %p1701_p2 = scmp.lt.u32.totalorder %s1692_s27, %s2147_s30 }
  0x33   : > { %p1695_p9 = pnand %p1694_p6, %p1693_p5  ;;  %p1700_p1 = por %p1699_p12, %p1698_p11 }
  0x35   : > { %p1696_p10 = pneg %p1695_p9  ;;  %p1702_p0 = por %p1701_p2, %p1700_p1 }
  0x37   : > { %p1703_p13 = pnand %p1702_p0, %p1696_p10 }
  0x39   : > { %1706 = shalt.err (!%p1703_p13)
}
  0x3a   : > { %s1707_s20 = scalar_lea.vmem %s2149_s0, 16  ;;  %s1955_s8 = smov [#allocation7]  }
  0x3b   : > { %p1708_p5 = scmp.ne.s32.totalorder %s2149_s0, %s1707_s20  ;;  %s1712_s13 = sshll.u32 %s1955_s8, 4  ;;  %s1713_s13 = int_to_ptr.vmem [resolvable:$false] %s1712_s13 }
  0x3c   : > { %s1714_s29 = scalar_lea.vmem %s1713_s13, 32  ;;  %p1715_p4 = scmp.lt.s32.totalorder %s2149_s0, %s1713_s13 }
  0x3d   : > { %p1710_p9 = pnand %p1708_p5, %p1694_p6  ;;  %p1716_p11 = scmp.lt.s32.totalorder %s1714_s29, %s1707_s20 }
  0x3f   : > { %p1711_p8 = pneg %p1710_p9  ;;  %p1717_p12 = por %p1716_p11, %p1715_p4 }
  0x41   : > { %p1718_p2 = pnand %p1717_p12, %p1711_p8 }
  0x43   : > { %1721 = shalt.err (!%p1718_p2)
}
  0x44   : > { %1533 = dma.hbm_to_vmem [thread:$0]  (!%p2155_p3), %s2147_s30, 16, %s2149_s0, %s2172_s16  }
  0x45   : > { %s2205_s11 = scalar_lea.hbm %s2601_s4, %s1414_s14  ;;  %p1407_p13 = scmp.ge.s32.totalorder %s1953_s10, 1 }
  0x46   : > { %p210_p8 = scmp.lt.s32.totalorder %s1953_s10, 33  ;;  %s1956_s6 = smov [#allocation4]  }
  0x47   : > { %s225_s8 = sshll.u32 %s1956_s6, 4  ;;  %s267_s0 = sand.u32 1, %s1921_s26   ;;  %s2213_s8 = int_to_ptr.vmem [resolvable:$true] %s225_s8 }
  0x48   : > { %p2209_p0 = pnand %p1407_p13, %p210_p8  ;;  %s1412_s24 = sshll.u32 %s267_s0, 7 }
  0x49   : > { %s269_s14 = scalar_lea.vmem [#allocation10], %s1412_s24  ;;  %s1722_s27 = scalar_lea.hbm %s2598_s1, 512 }
  0x4a   : > { %s2645_s20 = scalar_select %p2209_p0, 1, 0 }
  0x4b   : > { %p1523_p1 = pneg %p2209_p0  ;;  %s2224_s13 = sshll.u32 %s269_s14, 4  ;;  %s2271_s13 = int_to_ptr.vmem [resolvable:$true] %s2224_s13 }
  0x4c   : > { %p1723_p4 = scmp.ne.s32.totalorder %s2598_s1, %s1722_s27  ;;  %p1729_p9 = scmp.lt.u32.totalorder %s1722_s27, %s2598_s1 }
  0x4d   : > { %p2220_p3 = pnand %p1523_p1, %p2104_p7 }
  0x4f   : > { %p1724_p6 = pneg %p2220_p3 }
  0x51   : > { %p1725_p10 = pnand %p1724_p6, %p1723_p4 }
  0x53   : > { %p1726_p5 = pneg %p1725_p10 }
  0x55   : > { %p1731_p11 = pnand %p1729_p9, %p1726_p5 }
  0x57   : > { %1734 = shalt.err (!%p1731_p11)
}
  0x58   : > { %s1735_s0 = scalar_lea.vmem %s2213_s8, 512  ;;  %p1743_p8 = scmp.lt.s32.totalorder %s2213_s8, %s2213_s8 }
  0x59   : > { %p1736_p12 = scmp.ne.s32.totalorder %s2213_s8, %s1735_s0  ;;  %p1744_p1 = scmp.lt.s32.totalorder %s1735_s0, %s1735_s0 }
  0x5b   : > { %p1738_p2 = pnand %p1736_p12, %p1724_p6  ;;  %p1745_p4 = por %p1744_p1, %p1743_p8 }
  0x5d   : > { %p1739_p13 = pneg %p1738_p2 }
  0x5f   : > { %p1746_p10 = pnand %p1745_p4, %p1739_p13 }
  0x61   : > { %1749 = shalt.err (!%p1746_p10)
}
  0x62   : > { %s1957_s2 = smov 256   ;;  %s1958_s26 = smov 16  }
  0x63   : > { %1526 = dma.hbm_to_vmem [thread:$0]  (!%p2220_p3), %s2598_s1, 512, %s2213_s8, [#allocation5], %s1957_s2, %s1957_s2, %s1958_s26  }
  0x64   : > { %s1750_s7 = scalar_lea.hbm %s2600_s3, 16 }
  0x65   : > { %p1751_p5 = scmp.ne.s32.totalorder %s2600_s3, %s1750_s7  ;;  %p1757_p12 = scmp.lt.u32.totalorder %s1750_s7, %s2600_s3 }
  0x67   : > { %p1753_p9 = pnand %p1751_p5, %p1724_p6 }
  0x69   : > { %p1754_p11 = pneg %p1753_p9 }
  0x6b   : > { %p1759_p2 = pnand %p1757_p12, %p1754_p11 }
  0x6d   : > { %1762 = shalt.err (!%p1759_p2)
}
  0x6e   : > { %s1959_s15 = smov [#allocation9]   ;;  %s1763_s25 = scalar_lea.hbm %s2205_s11, 2048 }
  0x6f   : > { %1529 = dma.hbm_to_smem (!%p2220_p3), %s2600_s3, 16, %s1959_s15, [#allocation6]  }
  0x70   : > { %p1764_p6 = scmp.ne.s32.totalorder %s2205_s11, %s1763_s25  ;;  %p2647_p13 = scmp.ne.s32.totalorder %s2644_s17, 0 }
  0x71   : > { %s1768_s24 = scalar_lea.hbm %s2601_s4, 65536  ;;  %p1769_p10 = scmp.lt.u32.totalorder %s2205_s11, %s2601_s4 }
  0x72   : > { %p1765_p8 = pneg %p2647_p13  ;;  %p1770_p5 = scmp.lt.u32.totalorder %s1768_s24, %s1763_s25 }
  0x73   : > { %p1772_p9 = scmp.lt.u32.totalorder %s1763_s25, %s2205_s11 }
  0x74   : > { %p1766_p1 = pnand %p1765_p8, %p1764_p6  ;;  %p1771_p3 = por %p1770_p5, %p1769_p10 }
  0x76   : > { %p1767_p4 = pneg %p1766_p1  ;;  %p1773_p11 = por %p1772_p9, %p1771_p3 }
  0x78   : > { %p1774_p12 = pnand %p1773_p11, %p1767_p4 }
  0x7a   : > { %1777 = shalt.err (!%p1774_p12)
}
  0x7b   : > { %s1778_s7 = scalar_lea.vmem %s2271_s13, 2048  ;;  %s1960_s27 = smov [#allocation10]  }
  0x7c   : > { %p1779_p2 = scmp.ne.s32.totalorder %s2271_s13, %s1778_s7  ;;  %s1783_s6 = sshll.u32 %s1960_s27, 4  ;;  %s1784_s6 = int_to_ptr.vmem [resolvable:$false] %s1783_s6 }
  0x7d   : > { %s1785_s0 = scalar_lea.vmem %s1784_s6, 4096  ;;  %p1786_p0 = scmp.lt.s32.totalorder %s2271_s13, %s1784_s6 }
  0x7e   : > { %p1781_p6 = pnand %p1779_p2, %p1765_p8  ;;  %p1787_p10 = scmp.lt.s32.totalorder %s1785_s0, %s1778_s7 }
  0x80   : > { %p1782_p1 = pneg %p1781_p6  ;;  %p1788_p5 = por %p1787_p10, %p1786_p0 }
  0x82   : > { %p1789_p3 = pnand %p1788_p5, %p1782_p1 }
  0x84   : > { %1792 = shalt.err (!%p1789_p3)
}
  0x85   : > { %s1961_s15 = smov 128   ;;  %s1962_s8 = smov 64  }
  0x86   : > { %s1963_s2 = smov 4   ;;  %s160_s25 = sadd.s32 1, %s1909_s23 }
  0x87   : > { %1536 = dma.hbm_to_vmem [thread:$0]  (!%p2647_p13), %s2205_s11, 2048, %s2271_s13, %s2172_s16, %s1961_s15, %s1962_s8, %s1963_s2  }
  0x88   : > { %p167_p0 = scmp.ne.s32.totalorder %s1909_s23, %s1905_s22  ;;  %p2648_p8 = scmp.eq.s32.totalorder %s2110_s19, 0 }
  0x89   : > { %p2649_p4 = scmp.eq.s32.totalorder %s1953_s10, 0  ;;  %p173_p11 = scmp.ne.s32.totalorder %s1905_s22, %s1901_s21 }
  0x8a   : > { %s2305_s30 = scalar_select %p2648_p8, %s1909_s23, %s160_s25  }
  0x8b   : > { %p169_p9 = por %p167_p0, %p2649_p4  ;;  %s287_s26 = sand.u32 1, %s1909_s23  }
  0x8c   : > { %s1415_s24 = sshll.u32 %s1949_s9, 4  ;;  %p2315_p12 = por %p173_p11, %p2104_p7 }
  0x8d   : > { %s2322_s17 = scalar_lea.hbm %s2602_s5, %s1415_s24  ;;  %s290_s19 = scalar_lea.vmem [#allocation11], %s287_s26 }
  0x8e   : > { %s2650_s14 = scalar_select %p2315_p12, 1, 0 }
  0x8f   : > { %s297_s16 = sshll.u32 %s290_s19, 4  ;;  %p2651_p13 = scmp.lt.s32.totalorder %s1953_s10, 32  ;;  %s2330_s16 = int_to_ptr.vmem [resolvable:$true] %s297_s16 }
  0x90   : > { %s288_s11 = scalar_lea.sflag [#allocation12], %s287_s26  ;;  %s1793_s13 = scalar_lea.hbm %s2322_s17, 16 }
  0x91   : > { %p2326_p2 = pnand %p2651_p13, %p169_p9  ;;  %p1794_p6 = scmp.ne.s32.totalorder %s2322_s17, %s1793_s13 }
  0x92   : > { %s1798_s0 = scalar_lea.hbm %s2602_s5, 32  ;;  %p1799_p3 = scmp.lt.u32.totalorder %s2322_s17, %s2602_s5 }
  0x93   : > { %p1795_p1 = pneg %p2326_p2  ;;  %p1800_p0 = scmp.lt.u32.totalorder %s1798_s0, %s1793_s13 }
  0x94   : > { %p1802_p4 = scmp.lt.u32.totalorder %s1793_s13, %s2322_s17 }
  0x95   : > { %p1796_p10 = pnand %p1795_p1, %p1794_p6  ;;  %p1801_p8 = por %p1800_p0, %p1799_p3 }
  0x97   : > { %p1797_p5 = pneg %p1796_p10  ;;  %p1803_p9 = por %p1802_p4, %p1801_p8 }
  0x99   : > { %p1804_p11 = pnand %p1803_p9, %p1797_p5 }
  0x9b   : > { %1807 = shalt.err (!%p1804_p11)
}
  0x9c   : > { %s1808_s2 = scalar_lea.vmem %s2330_s16, 16  ;;  %s1964_s25 = smov [#allocation11]  }
  0x9d   : > { %p1809_p13 = scmp.ne.s32.totalorder %s2330_s16, %s1808_s2  ;;  %s1813_s26 = sshll.u32 %s1964_s25, 4  ;;  %s1814_s26 = int_to_ptr.vmem [resolvable:$false] %s1813_s26 }
  0x9e   : > { %s1815_s24 = scalar_lea.vmem %s1814_s26, 32  ;;  %p1816_p12 = scmp.lt.s32.totalorder %s2330_s16, %s1814_s26 }
  0x9f   : > { %p1811_p6 = pnand %p1809_p13, %p1795_p1  ;;  %p1817_p3 = scmp.lt.s32.totalorder %s1815_s24, %s1808_s2 }
  0xa1   : > { %p1812_p10 = pneg %p1811_p6  ;;  %p1818_p0 = por %p1817_p3, %p1816_p12 }
  0xa3   : > { %p1819_p8 = pnand %p1818_p0, %p1812_p10 }
  0xa5   : > { %1822 = shalt.err (!%p1819_p8)
}
  0xa6   : > { %1539 = dma.hbm_to_vmem [thread:$0]  (!%p2326_p2), %s2322_s17, 16, %s2330_s16, %s288_s11  }
  0xa7   : > { %p2653_p5 = scmp.ne.s32.totalorder %s2645_s20, 0 }
  0xa9   : > { %306 = sbr.rel (%p2653_p5) target bundleno = 855 (0x357), region = 44 }
  0xb0   : > { %1880 = dma.done.wait (%p2104_p7), [#allocation5], 512  }
  0xb1   : > { %1882 = vsyncadd (%p2104_p7), [#allocation5], 4294966784  ;;  %s2654_s29 = sadd.s32 4294967295, %s1953_s10   ;;  %s314_s19 = sand.u32 1, %s1929_s28  }
  0xb2   : > { %s312_s7 = sand.u32 1, %s2654_s29   ;;  %s2366_s21 = scalar_lea.vmem [#allocation7], %s314_s19 }
  0xb3   : > { %s313_s13 = scalar_lea.sflag [#allocation8], %s312_s7  ;;  %p2655_p12 = scmp.ne.s32.totalorder %s2637_s12, 0 }
  0xb5   : > { %1884 = dma.done.wait (%p2655_p12), %s313_s13, 16  }
  0xb6   : > { %1886 = vsyncadd (%p2655_p12), %s313_s13, 4294967280 }
  0xb7   : > { %1888 = dma.done.wait (%p2104_p7), [#allocation6], 16  }
  0xb8   : > { %1890 = vsyncadd (%p2104_p7), [#allocation6], 4294967280  ;;  %s2656_s20 = sld [smem:[#allocation18_spill]]  ;;  %s2657_s17 = sld [smem:[#allocation28_spill]] }
  0xbe   : > { %s326_s16 = sand.u32 1, %s2656_s20   ;;  %p2658_p2 = scmp.ne.s32.totalorder %s2657_s17, 0 }
  0xbf   : > { %s1419_s11 = sshll.u32 %s326_s16, 7 }
  0xc0   : > { %s2377_s27 = scalar_lea.vmem [#allocation10], %s1419_s11 }
  0xc1   : > { %1892 = dma.done.wait (%p2658_p2), %s313_s13, 2048  }
  0xc2   : > { %1894 = vsyncadd (%p2658_p2), %s313_s13, 4294965248  ;;  %s333_s12 = sand.u32 1, %s1905_s22   ;;  %p2659_p1 = scmp.ne.s32.totalorder %s2650_s14, 0 }
  0xc3   : > { %s334_s6 = scalar_lea.sflag [#allocation12], %s333_s12  ;;  %s2384_s0 = scalar_lea.vmem [#allocation11], %s333_s12 }
  0xc4   : > { %1896 = dma.done.wait (%p2659_p1), %s334_s6, 16  }
  0xc5   : > { %1898 = vsyncadd (%p2659_p1), %s334_s6, 4294967280 }
  0xc6   : > { %341 = sfence }
  0xc7   : > { %s2660_s18 = sld [smem:[#allocation22_spill]]  ;;  %s2661_s25 = sld [smem:[#allocation31_spill]] }
  0xc8   : > { %s2662_s24 = sld [smem:[#allocation21_spill]] }
  0xcd   : > { %p373_p7 = scmp.lt.s32.totalorder %s2660_s18, 1 }
  0xce   : > { %p1421_p4 = scmp.ne.s32.totalorder %s2662_s24, 0 }
  0xcf   : > { %s2690_s18 = smov (!%p373_p7, %s2660_s18), 1  ;;  %s2663_s19 = sld [smem:[#allocation29_spill]] (!%p1421_p4)  ;;  %v391_v1 = vlaneseq (!%p1421_p4)  ;;  %v497_v4 = vld [vmem:[#allocation4 + $0x4] ss:$8 sm:$0x3] (!%p1421_p4)  ;;  %v1973_v20 = vmov (!%p1421_p4), 0.0  }
  0xd0   : > { %s1420_s15 = sshll.u32 %s2690_s18, 1  ;;  %381 = sbr.rel (%p1421_p4) target bundleno = 393 (0x189), region = 68  ;;  %v729_v7 = vld [vmem:[#allocation4 + $0x4] ss:$8 sm:$0x3] (!%p1421_p4) }
  0xd1   : > { %s2395_s26 = scalar_lea.vmem %s2661_s25, %s1420_s15  ;;  %s1965_s14 = smov (!%p1421_p4), 1   ;;  %v399_v3 = vshrl.u32 (!%p1421_p4), %v391_v1, 7  ;;  %382 = vst [vmem:[#allocation3] sm:$0x3] (!%p1421_p4), %v1973_v20  ;;  %v2422_v21 = vand.u32 (!%p1421_p4), 127, %v391_v1 }
  0xd2   : > { %s1966_s13 = smov (!%p1421_p4), 16   ;;  %s1967_s20 = smov (!%p1421_p4), 127   ;;  %v474_v22 = vld [vmem:[#allocation4 + $0x3] ss:$8 sm:$0x3] (!%p1421_p4) }
  0xd3   : > { %v2404_v5 = vsub.s32 (!%p1421_p4), 0, %v399_v3  ;;  %v2406_v6 = vsub.s32 (!%p1421_p4), 1, %v399_v3  ;;  %s1968_s11 = smov (!%p1421_p4), 112   ;;  %s1969_s12 = smov (!%p1421_p4), 17   ;;  %vm470_vm0 = vcmp.lt.s32.totalorder (!%p1421_p4), %v2422_v21, 1  ;;  %vm416_vm1 = vcmp.lt.s32.totalorder (!%p1421_p4), %v2422_v21, 16 }
  0xd4   : > { %s1970_s6 = smov (!%p1421_p4), 15   ;;  %s1971_s18 = smov (!%p1421_p4), 113   ;;  %v420_v23 = vld [vmem:[#allocation4 + $0x1] ss:$8 sm:$0x3] (!%p1421_p4)  ;;  %vm519_vm2 = vcmp.lt.s32.totalorder (!%p1421_p4), %v2422_v21, 127 }
  0xd5   : > { %v383_v0 = vld [vmem:[%s2663_s19] sm:$0xff] (!%p1421_p4)  ;;  %v502_v8 = vrot.slane (!%p1421_p4), %v497_v4, %v2404_v5  ;;  %v506_v9 = vrot.slane (!%p1421_p4), %v497_v4, %v2406_v6  ;;  %v734_v10 = vrot.slane (!%p1421_p4), %v729_v7, %v2404_v5  ;;  %v738_v11 = vrot.slane (!%p1421_p4), %v729_v7, %v2406_v6  ;;  %v1422_v14 = vld [vmem:[%s2663_s19 + $0x8] sm:$0xff] (!%p1421_p4)  ;;  %s1972_s15 = smov (!%p1421_p4), 111  }
  0xd6   : > { %466 = vrot.lane.b32.xlu1 (!%p1421_p4), %v383_v0, %s1965_s14  ;;  %412 = vrot.lane.b32.xlu0 (!%p1421_p4), %v383_v0, %s1966_s13  ;;  %v385_v2 = vcombine.high (!%p1421_p4), %v383_v0, %v383_v0  ;;  %v626_v18 = vcombine.high (!%p1421_p4), %v1422_v14, %v1422_v14  ;;  %v523_v26 = vld [vmem:[#allocation4 + $0x5] ss:$8 sm:$0x3] (!%p1421_p4)  ;;  %v479_v27 = vrot.slane (!%p1421_p4), %v474_v22, %v2404_v5  ;;  %v577_v43 = vld [vmem:[#allocation4 + $0x7] ss:$8 sm:$0x3] (!%p1421_p4) }
  0xd7   : > { %v507_v12 = vcombine.low %v502_v8, %v506_v9  ;;  %v739_v13 = vcombine.low %v734_v10, %v738_v11  ;;  %v483_v28 = vrot.slane %v474_v22, %v2406_v6  ;;  %v425_v29 = vrot.slane %v420_v23, %v2404_v5  ;;  %v657_v56 = vld [vmem:[#allocation4 + $0x1] ss:$8 sm:$0x3]  ;;  %v707_v3 = vld [vmem:[#allocation4 + $0x3] ss:$8 sm:$0x3] }
  0xd8   : > { %v429_v30 = vrot.slane %v420_v23, %v2406_v6  ;;  %v528_v33 = vrot.slane %v523_v26, %v2404_v5  ;;  %v532_v34 = vrot.slane %v523_v26, %v2406_v6  ;;  %vm573_vm3 = vcmp.lt.s32.totalorder %v2422_v21, 112 }
  0xd9   : > { %v509_v15 = vmul.f32 %v507_v12, %v383_v0  ;;  %v741_v16 = vmul.f32 %v1422_v14, %v739_v13  ;;  %v582_v54 = vrot.slane %v577_v43, %v2404_v5  ;;  %v586_v55 = vrot.slane %v577_v43, %v2406_v6 }
  0xda   : > { %468 = vrot.lane.b32.xlu1 %v385_v2, %s1965_s14  ;;  %414 = vrot.lane.b32.xlu0 %v385_v2, %s1966_s13  ;;  %v662_v1 = vrot.slane %v657_v56, %v2404_v5  ;;  %vm393_vm4 = vcmp.lt.s32.totalorder %v2422_v21, 17  ;;  %vm446_vm5 = vcmp.lt.s32.totalorder %v2422_v21, 15  ;;  %vm549_vm6 = vcmp.lt.s32.totalorder %v2422_v21, 113 }
  0xdb   : > { %v511_v17 = vcombine.high %v509_v15, %v509_v15  ;;  %513 = vst [vmem:[#allocation2 + $0x20] sm:$0xf] %v509_v15  ;;  %v743_v19 = vcombine.high %v741_v16, %v741_v16  ;;  %745 = vst [vmem:[#allocation2 + $0x70] sm:$0xf] %v741_v16  ;;  %v716_v15 = vrot.slane %v707_v3, %v2406_v6  ;;  %vm603_vm7 = vcmp.lt.s32.totalorder %v2422_v21, 111 }
  0xdc   : > { %v753_v16 = vld [vmem:[#allocation4 + $0x5] ss:$8 sm:$0x3] }
  0xdd   : > { %514 = vst [vmem:[#allocation2 + $0x28] sm:$0xf] %v511_v17  ;;  %746 = vst [vmem:[#allocation2 + $0x78] sm:$0xf] %v743_v19  ;;  %v758_v26 = vrot.slane %v753_v16, %v2404_v5 }
  0xde   : > { %517 = vrot.lane.b32.xlu1 %v385_v2, %s1967_s20  ;;  %515 = vrot.lane.b32.xlu0 %v383_v0, %s1967_s20 }
  0xe2   : > { %571 = vrot.lane.b32.xlu1 %v385_v2, %s1968_s11  ;;  %569 = vrot.lane.b32.xlu0 %v383_v0, %s1968_s11 }
  0xe6   : > { %653 = vrot.lane.b32.xlu1 %v626_v18, %s1966_s13  ;;  %651 = vrot.lane.b32.xlu0 %v1422_v14, %s1966_s13 }
  0xea   : > { %703 = vrot.lane.b32.xlu1 %v626_v18, %s1965_s14  ;;  %701 = vrot.lane.b32.xlu0 %v1422_v14, %s1965_s14 }
  0xee   : > { %749 = vrot.lane.b32.xlu1 %v626_v18, %s1967_s20  ;;  %747 = vrot.lane.b32.xlu0 %v1422_v14, %s1967_s20 }
  0xf2   : > { %799 = vrot.lane.b32.xlu1 %v626_v18, %s1968_s11  ;;  %797 = vrot.lane.b32.xlu0 %v1422_v14, %s1968_s11 }
  0xf6   : > { %389 = vrot.lane.b32.xlu1 %v385_v2, %s1969_s12  ;;  %387 = vrot.lane.b32.xlu0 %v383_v0, %s1969_s12 }
  0xfa   : > { %444 = vrot.lane.b32.xlu1 %v385_v2, %s1970_s6  ;;  %442 = vrot.lane.b32.xlu0 %v383_v0, %s1970_s6 }
  0xfe   : > { %547 = vrot.lane.b32.xlu1 %v385_v2, %s1971_s18  ;;  %545 = vrot.lane.b32.xlu0 %v383_v0, %s1971_s18 }
 0x102   : > { %601 = vrot.lane.b32.xlu1 %v385_v2, %s1972_s15  ;;  %599 = vrot.lane.b32.xlu0 %v383_v0, %s1972_s15  ;;  %v666_v2 = vrot.slane %v657_v56, %v2406_v6 }
 0x106   : > { %630 = vrot.lane.b32.xlu1 %v626_v18, %s1969_s12  ;;  %628 = vrot.lane.b32.xlu0 %v1422_v14, %s1969_s12 }
 0x10a   : > { %681 = vrot.lane.b32.xlu1 %v626_v18, %s1970_s6  ;;  %679 = vrot.lane.b32.xlu0 %v1422_v14, %s1970_s6 }
 0x10e   : > { %777 = vrot.lane.b32.xlu1 %v626_v18, %s1971_s18  ;;  %775 = vrot.lane.b32.xlu0 %v1422_v14, %s1971_s18 }
 0x112   : > { %827 = vrot.lane.b32.xlu1 %v626_v18, %s1972_s15  ;;  %825 = vrot.lane.b32.xlu0 %v1422_v14, %s1972_s15  ;;  %v712_v14 = vrot.slane %v707_v3, %v2404_v5 }
 0x148   : > { %v467_v24 = vpop.permute.xlu1 %466  ;;  %v413_v25 = vpop.permute.xlu0 %412 }
 0x14c   : > { %v469_v31 = vpop.permute.xlu1 %468  ;;  %v415_v32 = vpop.permute.xlu0 %414 }
 0x14d   : > { %v471_v35 = vsel %vm470_vm0, %v467_v24, %v469_v31  ;;  %v472_v36 = vsel %vm470_vm0, %v469_v31, %v467_v24  ;;  %v417_v37 = vsel %vm416_vm1, %v413_v25, %v415_v32  ;;  %v418_v38 = vsel %vm416_vm1, %v415_v32, %v413_v25 }
 0x14e   : > { %v486_v39 = vmul.f32 %v479_v27, %v472_v36  ;;  %v487_v40 = vmul.f32 %v483_v28, %v471_v35  ;;  %v432_v41 = vmul.f32 %v425_v29, %v418_v38  ;;  %v433_v42 = vmul.f32 %v429_v30, %v417_v37  ;;  %v803_v28 = vld [vmem:[#allocation4 + $0x7] ss:$8 sm:$0x3] }
 0x14f   : > { %v762_v27 = vrot.slane %v753_v16, %v2406_v6  ;;  %v808_v37 = vrot.slane %v803_v28, %v2404_v5  ;;  %v812_v38 = vrot.slane %v803_v28, %v2406_v6 }
 0x150   : > { %v490_v44 = vrot.slane %v486_v39, 4  ;;  %v491_v45 = vrot.slane %v487_v40, 4  ;;  %v436_v46 = vrot.slane %v432_v41, 4  ;;  %v437_v47 = vrot.slane %v433_v42, 4  ;;  %v518_v48 = vpop.permute.xlu1 %517  ;;  %v516_v49 = vpop.permute.xlu0 %515 }
 0x151   : > { %v520_v50 = vsel %vm519_vm2, %v516_v49, %v518_v48  ;;  %v521_v51 = vsel %vm519_vm2, %v518_v48, %v516_v49  ;;  %v396_v39 = vld [vmem:[#allocation4] ss:$8 sm:$0x3] }
 0x152   : > { %494 = vst [vmem:[#allocation2 + $0x10] sm:$0xf0] %v490_v44  ;;  %495 = vst [vmem:[#allocation2 + $0x18] sm:$0xf0] %v491_v45  ;;  %v535_v52 = vmul.f32 %v528_v33, %v520_v50  ;;  %v536_v53 = vmul.f32 %v532_v34, %v521_v51  ;;  %v401_v48 = vrot.slane %v396_v39, %v2404_v5 }
 0x153   : > { %440 = vst [vmem:[#allocation2] sm:$0xf0] %v436_v46  ;;  %441 = vst [vmem:[#allocation2 + $0x8] sm:$0xf0] %v437_v47  ;;  %v405_v49 = vrot.slane %v396_v39, %v2406_v6 }
 0x154   : > { %v539_v57 = vrot.slane %v535_v52, 4  ;;  %v540_v58 = vrot.slane %v536_v53, 4  ;;  %v572_v59 = vpop.permute.xlu1 %571  ;;  %v570_v60 = vpop.permute.xlu0 %569  ;;  %v450_v50 = vld [vmem:[#allocation4 + $0x2] ss:$8 sm:$0x3] }
 0x155   : > { %v574_v61 = vsel %vm573_vm3, %v570_v60, %v572_v59  ;;  %v575_v62 = vsel %vm573_vm3, %v572_v59, %v570_v60  ;;  %v455_v59 = vrot.slane %v450_v50, %v2404_v5  ;;  %v459_v60 = vrot.slane %v450_v50, %v2406_v6 }
 0x156   : > { %543 = vst [vmem:[#allocation2 + $0x20] sm:$0xf0] %v539_v57  ;;  %544 = vst [vmem:[#allocation2 + $0x28] sm:$0xf0] %v540_v58  ;;  %v589_v63 = vmul.f32 %v582_v54, %v574_v61  ;;  %v590_v0 = vmul.f32 %v586_v55, %v575_v62 }
 0x157   : > { %v553_v61 = vld [vmem:[#allocation4 + $0x6] ss:$8 sm:$0x3] }
 0x158   : > { %v593_v4 = vrot.slane %v589_v63, 4  ;;  %v594_v7 = vrot.slane %v590_v0, 4  ;;  %v654_v8 = vpop.permute.xlu1 %653  ;;  %v652_v9 = vpop.permute.xlu0 %651 }
 0x159   : > { %v655_v10 = vsel %vm416_vm1, %v652_v9, %v654_v8  ;;  %v656_v11 = vsel %vm416_vm1, %v654_v8, %v652_v9  ;;  %v607_v8 = vld [vmem:[#allocation4 + $0x10] ss:$8 sm:$0x3] }
 0x15a   : > { %597 = vst [vmem:[#allocation2 + $0x30] sm:$0xf0] %v593_v4  ;;  %598 = vst [vmem:[#allocation2 + $0x38] sm:$0xf0] %v594_v7  ;;  %v669_v12 = vmul.f32 %v662_v1, %v656_v11  ;;  %v670_v13 = vmul.f32 %v666_v2, %v655_v10  ;;  %v558_v4 = vrot.slane %v553_v61, %v2404_v5 }
 0x15b   : > { %v562_v7 = vrot.slane %v553_v61, %v2406_v6  ;;  %v616_v16 = vrot.slane %v607_v8, %v2406_v6 }
 0x15c   : > { %v673_v17 = vrot.slane %v669_v12, 4  ;;  %v674_v18 = vrot.slane %v670_v13, 4  ;;  %v704_v19 = vpop.permute.xlu1 %703  ;;  %v702_v20 = vpop.permute.xlu0 %701 }
 0x15d   : > { %v705_v22 = vsel %vm470_vm0, %v702_v20, %v704_v19  ;;  %v706_v23 = vsel %vm470_vm0, %v704_v19, %v702_v20 }
 0x15e   : > { %677 = vst [vmem:[#allocation2 + $0x50] sm:$0xf0] %v673_v17  ;;  %678 = vst [vmem:[#allocation2 + $0x58] sm:$0xf0] %v674_v18  ;;  %v719_v24 = vmul.f32 %v712_v14, %v706_v23  ;;  %v720_v25 = vmul.f32 %v716_v15, %v705_v22  ;;  %v612_v15 = vrot.slane %v607_v8, %v2404_v5 }
 0x15f   : > { %v634_v17 = vld [vmem:[#allocation4] ss:$8 sm:$0x3] }
 0x160   : > { %v723_v29 = vrot.slane %v719_v24, 4  ;;  %v724_v30 = vrot.slane %v720_v25, 4  ;;  %v750_v31 = vpop.permute.xlu1 %749  ;;  %v748_v32 = vpop.permute.xlu0 %747  ;;  %v639_v25 = vrot.slane %v634_v17, %v2404_v5 }
 0x161   : > { %v751_v33 = vsel %vm519_vm2, %v748_v32, %v750_v31  ;;  %v752_v34 = vsel %vm519_vm2, %v750_v31, %v748_v32 }
 0x162   : > { %727 = vst [vmem:[#allocation2 + $0x60] sm:$0xf0] %v723_v29  ;;  %728 = vst [vmem:[#allocation2 + $0x68] sm:$0xf0] %v724_v30  ;;  %v765_v35 = vmul.f32 %v758_v26, %v751_v33  ;;  %v766_v36 = vmul.f32 %v762_v27, %v752_v34  ;;  %v643_v26 = vrot.slane %v634_v17, %v2406_v6 }
 0x163   : > { %v685_v27 = vld [vmem:[#allocation4 + $0x2] ss:$8 sm:$0x3] }
 0x164   : > { %v769_v40 = vrot.slane %v765_v35, 4  ;;  %v770_v41 = vrot.slane %v766_v36, 4  ;;  %v800_v42 = vpop.permute.xlu1 %799  ;;  %v798_v43 = vpop.permute.xlu0 %797  ;;  %v690_v34 = vrot.slane %v685_v27, %v2404_v5  ;;  %v694_v35 = vrot.slane %v685_v27, %v2406_v6  ;;  %v781_v36 = vld [vmem:[#allocation4 + $0x6] ss:$8 sm:$0x3] }
 0x165   : > { %v801_v44 = vsel %vm573_vm3, %v798_v43, %v800_v42  ;;  %v802_v45 = vsel %vm573_vm3, %v800_v42, %v798_v43  ;;  %v786_v43 = vrot.slane %v781_v36, %v2404_v5 }
 0x166   : > { %773 = vst [vmem:[#allocation2 + $0x70] sm:$0xf0] %v769_v40  ;;  %774 = vst [vmem:[#allocation2 + $0x78] sm:$0xf0] %v770_v41  ;;  %v815_v46 = vmul.f32 %v808_v37, %v801_v44  ;;  %v816_v47 = vmul.f32 %v812_v38, %v802_v45  ;;  %v790_v44 = vrot.slane %v781_v36, %v2406_v6 }
 0x167   : > { %v831_v45 = vld [vmem:[#allocation4 + $0x10] ss:$8 sm:$0x3] }
 0x168   : > { %v819_v51 = vrot.slane %v815_v46, 4  ;;  %v820_v52 = vrot.slane %v816_v47, 4  ;;  %v390_v53 = vpop.permute.xlu1 %389  ;;  %v388_v54 = vpop.permute.xlu0 %387 }
 0x169   : > { %v394_v55 = vsel %vm393_vm4, %v388_v54, %v390_v53  ;;  %v395_v56 = vsel %vm393_vm4, %v390_v53, %v388_v54  ;;  %v840_v53 = vrot.slane %v831_v45, %v2406_v6 }
 0x16a   : > { %823 = vst [vmem:[#allocation2 + $0x80] sm:$0xf0] %v819_v51  ;;  %824 = vst [vmem:[#allocation2 + $0x88] sm:$0xf0] %v820_v52  ;;  %v408_v57 = vmul.f32 %v401_v48, %v395_v56  ;;  %v409_v58 = vmul.f32 %v405_v49, %v394_v55  ;;  %v836_v52 = vrot.slane %v831_v45, %v2404_v5 }
 0x16c   : > { %410 = vst [vmem:[#allocation2] sm:$0xf] %v408_v57  ;;  %411 = vst [vmem:[#allocation2 + $0x8] sm:$0xf] %v409_v58  ;;  %v445_v62 = vpop.permute.xlu1 %444  ;;  %v443_v63 = vpop.permute.xlu0 %442 }
 0x16d   : > { %v447_v0 = vsel %vm446_vm5, %v443_v63, %v445_v62  ;;  %v448_v1 = vsel %vm446_vm5, %v445_v62, %v443_v63 }
 0x16e   : > { %v462_v2 = vmul.f32 %v455_v59, %v448_v1  ;;  %v463_v3 = vmul.f32 %v459_v60, %v447_v0 }
 0x170   : > { %464 = vst [vmem:[#allocation2 + $0x10] sm:$0xf] %v462_v2  ;;  %465 = vst [vmem:[#allocation2 + $0x18] sm:$0xf] %v463_v3  ;;  %v548_v9 = vpop.permute.xlu1 %547  ;;  %v546_v10 = vpop.permute.xlu0 %545 }
 0x171   : > { %v550_v11 = vsel %vm549_vm6, %v546_v10, %v548_v9  ;;  %v551_v12 = vsel %vm549_vm6, %v548_v9, %v546_v10 }
 0x172   : > { %v565_v13 = vmul.f32 %v558_v4, %v550_v11  ;;  %v566_v14 = vmul.f32 %v562_v7, %v551_v12 }
 0x174   : > { %567 = vst [vmem:[#allocation2 + $0x30] sm:$0xf] %v565_v13  ;;  %568 = vst [vmem:[#allocation2 + $0x38] sm:$0xf] %v566_v14  ;;  %v602_v18 = vpop.permute.xlu1 %601  ;;  %v600_v19 = vpop.permute.xlu0 %599 }
 0x175   : > { %v604_v20 = vsel %vm603_vm7, %v600_v19, %v602_v18  ;;  %v605_v22 = vsel %vm603_vm7, %v602_v18, %v600_v19 }
 0x176   : > { %v619_v23 = vmul.f32 %v612_v15, %v604_v20  ;;  %v620_v24 = vmul.f32 %v616_v16, %v605_v22 }
 0x178   : > { %621 = vst [vmem:[#allocation2 + $0x40] sm:$0xf] %v619_v23  ;;  %622 = vst [vmem:[#allocation2 + $0x48] sm:$0xf] %v620_v24  ;;  %v631_v28 = vpop.permute.xlu1 %630  ;;  %v629_v29 = vpop.permute.xlu0 %628 }
 0x179   : > { %v632_v30 = vsel %vm393_vm4, %v629_v29, %v631_v28  ;;  %v633_v31 = vsel %vm393_vm4, %v631_v28, %v629_v29 }
 0x17a   : > { %v646_v32 = vmul.f32 %v639_v25, %v633_v31  ;;  %v647_v33 = vmul.f32 %v643_v26, %v632_v30 }
 0x17c   : > { %649 = vst [vmem:[#allocation2 + $0x50] sm:$0xf] %v646_v32  ;;  %650 = vst [vmem:[#allocation2 + $0x58] sm:$0xf] %v647_v33  ;;  %v682_v37 = vpop.permute.xlu1 %681  ;;  %v680_v38 = vpop.permute.xlu0 %679 }
 0x17d   : > { %v683_v39 = vsel %vm446_vm5, %v680_v38, %v682_v37  ;;  %v684_v40 = vsel %vm446_vm5, %v682_v37, %v680_v38 }
 0x17e   : > { %v697_v41 = vmul.f32 %v690_v34, %v684_v40  ;;  %v698_v42 = vmul.f32 %v694_v35, %v683_v39 }
 0x180   : > { %699 = vst [vmem:[#allocation2 + $0x60] sm:$0xf] %v697_v41  ;;  %700 = vst [vmem:[#allocation2 + $0x68] sm:$0xf] %v698_v42  ;;  %v778_v46 = vpop.permute.xlu1 %777  ;;  %v776_v47 = vpop.permute.xlu0 %775 }
 0x181   : > { %v779_v48 = vsel %vm549_vm6, %v776_v47, %v778_v46  ;;  %v780_v49 = vsel %vm549_vm6, %v778_v46, %v776_v47 }
 0x182   : > { %v793_v50 = vmul.f32 %v786_v43, %v779_v48  ;;  %v794_v51 = vmul.f32 %v790_v44, %v780_v49 }
 0x184   : > { %795 = vst [vmem:[#allocation2 + $0x80] sm:$0xf] %v793_v50  ;;  %796 = vst [vmem:[#allocation2 + $0x88] sm:$0xf] %v794_v51  ;;  %v828_v54 = vpop.permute.xlu1 %827  ;;  %v826_v55 = vpop.permute.xlu0 %825 }
 0x185   : > { %v829_v56 = vsel %vm603_vm7, %v826_v55, %v828_v54  ;;  %v830_v57 = vsel %vm603_vm7, %v828_v54, %v826_v55 }
 0x186   : > { %v843_v58 = vmul.f32 %v836_v52, %v829_v56  ;;  %v844_v59 = vmul.f32 %v840_v53, %v830_v57 }
 0x188   : > { %845 = vst [vmem:[#allocation2 + $0x90] sm:$0xf] %v843_v58  ;;  %846 = vst [vmem:[#allocation2 + $0x98] sm:$0xf] %v844_v59 }
 0x189 PF: > { %v882_v60 = vld [vmem:[#allocation2 + $0x8] sm:$0xff]  ;;  %v884_v61 = vld [vmem:[#allocation2 + $0x18] sm:$0xff]  ;;  %v881_v63 = vld [vmem:[#allocation2] sm:$0xff]  ;;  %v1974_v1 = vmov 0.0   ;;  %vm896_vm8 = vcmask 1043456   ;;  %vm892_vm9 = vcmask 293888  }
 0x18a   : > { %v1119_v5 = vld [vmem:[#allocation2 + $0x58] sm:$0xff]  ;;  %v1493_v62 = vpack.c.bf16 %v884_v61, %v882_v60  ;;  %v1121_v6 = vld [vmem:[#allocation2 + $0x68] sm:$0xff]  ;;  %v883_v0 = vld [vmem:[#allocation2 + $0x10] sm:$0xff]  ;;  %967 = vmatprep.mubr.f32.mxu1 %v1974_v1  ;;  %1198 = vmatprep.mubr.f32.mxu0 %v1974_v1 }
 0x18b   : > { %v1501_v2 = vpack.c.bf16 %v1121_v6, %v1119_v5  ;;  %v1495_v3 = vpack.c.bf16 %v883_v0, %v881_v63  ;;  %v1118_v4 = vld [vmem:[#allocation2 + $0x50] sm:$0xff]  ;;  %v1120_v21 = vld [vmem:[#allocation2 + $0x60] sm:$0xff]  ;;  %v886_v7 = vld [vmem:[#allocation2 + $0x28] sm:$0xff] }
 0x18c   : > { %1494 = vmatprep.subr.bf16.mxu1 %v1493_v62  ;;  %v1503_v8 = vpack.c.bf16 %v1120_v21, %v1118_v4  ;;  %v888_v9 = vld [vmem:[#allocation2 + $0x38] sm:$0xff]  ;;  %v1125_v11 = vld [vmem:[#allocation2 + $0x88] sm:$0xff]  ;;  %v885_v14 = vld [vmem:[#allocation2 + $0x20] sm:$0xff] }
 0x18d   : > { %v1123_v10 = vld [vmem:[#allocation2 + $0x78] sm:$0xff]  ;;  %1502 = vmatprep.subr.bf16.mxu0 %v1501_v2  ;;  %1496 = vmatpush1.bf16.msra.mxu1 %v1495_v3  ;;  %v1497_v12 = vpack.c.bf16 %v888_v9, %v886_v7  ;;  %v887_v15 = vld [vmem:[#allocation2 + $0x30] sm:$0xff]  ;;  %v1124_v18 = vld [vmem:[#allocation2 + $0x80] sm:$0xff] }
 0x18e   : > { %v1505_v13 = vpack.c.bf16 %v1125_v11, %v1123_v10  ;;  %v1122_v16 = vld [vmem:[#allocation2 + $0x70] sm:$0xff]  ;;  %1504 = vmatpush1.bf16.msra.mxu0 %v1503_v8  ;;  %v1499_v17 = vpack.c.bf16 %v887_v15, %v885_v14  ;;  %v890_v20 = vld [vmem:[#allocation2 + $0x48] sm:$0xf]  ;;  %v889_v23 = vld [vmem:[#allocation2 + $0x40] sm:$0xf] }
 0x18f   : > { %1498 = vmatprep.subr.bf16.mxu1 %v1497_v12  ;;  %v1507_v19 = vpack.c.bf16 %v1124_v18, %v1122_v16  ;;  %v1127_v22 = vld [vmem:[#allocation2 + $0x98] sm:$0xf]  ;;  %v1126_v24 = vld [vmem:[#allocation2 + $0x90] sm:$0xf]  ;;  %v847_v25 = vld [vmem:[%s2366_s21] sm:$0x1] }
 0x190   : > { %1506 = vmatprep.subr.bf16.mxu0 %v1505_v13  ;;  %v1676_v26 = vld [vmem:[%s2377_s27 + $0x40] sm:$0xff]   ;;  %v1678_v28 = vld [vmem:[%s2377_s27 + $0x48] sm:$0xff]   ;;  %v1680_v30 = vld [vmem:[%s2377_s27 + $0x50] sm:$0xff]   ;;  %s2664_s21 = sld [smem:[#allocation21_spill]] }
 0x191   : > { %1500 = vmatpush1.bf16.msra.mxu1 %v1499_v17  ;;  %v1677_v27 = vld [vmem:[%s2377_s27] sm:$0xff]   ;;  %v1679_v29 = vld [vmem:[%s2377_s27 + $0x8] sm:$0xff]   ;;  %v1681_v31 = vld [vmem:[%s2377_s27 + $0x10] sm:$0xff]  }
 0x192   : > { %1508 = vmatpush1.bf16.msra.mxu0 %v1507_v19  ;;  %1423 = vmatprep.subr.msk.mxu1 %vm896_vm8, %v890_v20  ;;  %v1682_v32 = vld [vmem:[%s2377_s27 + $0x58] sm:$0xff]   ;;  %v1684_v34 = vld [vmem:[%s2377_s27 + $0x60] sm:$0xff]   ;;  %v1686_v36 = vld [vmem:[%s2377_s27 + $0x68] sm:$0xff]  }
 0x193   : > { %1442 = vmatprep.subr.msk.mxu0 %vm896_vm8, %v1127_v22  ;;  %v1683_v33 = vld [vmem:[%s2377_s27 + $0x18] sm:$0xff]   ;;  %v1685_v35 = vld [vmem:[%s2377_s27 + $0x20] sm:$0xff]   ;;  %v1687_v37 = vld [vmem:[%s2377_s27 + $0x28] sm:$0xff]  }
 0x194   : > { %v1688_v38 = vld [vmem:[%s2377_s27 + $0x70] sm:$0xff]   ;;  %v1690_v40 = vld [vmem:[%s2377_s27 + $0x78] sm:$0xff]  }
 0x195   : > { %1424 = vmatpush1.msk.msra.mxu1 %vm896_vm8, %v889_v23  ;;  %v1689_v39 = vld [vmem:[%s2377_s27 + $0x30] sm:$0xff]   ;;  %v1691_v41 = vld [vmem:[%s2377_s27 + $0x38] sm:$0xff]  }
 0x196   : > { %1443 = vmatpush1.msk.msra.mxu0 %vm896_vm8, %v1126_v24  ;;  %1425 = vmatmul.mubr.msk.f32.vlgmr.msra.gmra.mrb[0].mxu1 %vm892_vm9, %v847_v25  ;;  %s848_s8 = sld [smem:[#allocation9 + %s2664_s21]]  ;;  %v978_v61 = vld [vmem:[#allocation3] sm:$0x1]  ;;  %v1209_v6 = vld [vmem:[#allocation3 + $0x1] sm:$0x1]  ;;  %p1445_p9 = scmp.ne.s32.totalorder %s2664_s21, 15 }
 0x197   : > { %1444 = vmatmul.mubr.msk.f32.vlgmr.msra.gmra.mrb[0].mxu0 %vm892_vm9, %v847_v25  ;;  %1449 = vmatprep.subr.bf16.mxu1 %v1676_v26  ;;  %v1446_v9 = vld [vmem:[%s2384_s0] ss:$0 sm:$0xff] (!%p1445_p9) }
 0x198   : > { %1471 = vmatprep.subr.bf16.mxu0 %v1676_v26  ;;  %1450 = vmatpush3.bf16.msra.mxu1 %v1677_v27 }
 0x199   : > { %1472 = vmatpush3.bf16.msra.mxu0 %v1677_v27  ;;  %1451 = vmatprep.subr.bf16.mxu1 %v1678_v28 }
 0x19a   : > { %1473 = vmatprep.subr.bf16.mxu0 %v1678_v28 }
 0x19c   : > { %1452 = vmatpush3.bf16.msra.mxu1 %v1679_v29  ;;  %v891_v42 = vstv %s848_s8 }
 0x19d   : > { %1474 = vmatpush3.bf16.msra.mxu0 %v1679_v29  ;;  %1453 = vmatprep.subr.bf16.mxu1 %v1680_v30 }
 0x19e   : > { %1475 = vmatprep.subr.bf16.mxu0 %v1680_v30 }
 0x1a0   : > { %1454 = vmatpush3.bf16.msra.mxu1 %v1681_v31 }
 0x1a1   : > { %1476 = vmatpush3.bf16.msra.mxu0 %v1681_v31  ;;  %1455 = vmatprep.subr.bf16.mxu1 %v1682_v32 }
 0x1a2   : > { %1477 = vmatprep.subr.bf16.mxu0 %v1682_v32 }
 0x1a4   : > { %1456 = vmatpush3.bf16.msra.mxu1 %v1683_v33 }
 0x1a5   : > { %1478 = vmatpush3.bf16.msra.mxu0 %v1683_v33  ;;  %1457 = vmatprep.subr.bf16.mxu1 %v1684_v34 }
 0x1a6   : > { %1479 = vmatprep.subr.bf16.mxu0 %v1684_v34 }
 0x1a8   : > { %1458 = vmatpush3.bf16.msra.mxu1 %v1685_v35 }
 0x1a9   : > { %1480 = vmatpush3.bf16.msra.mxu0 %v1685_v35  ;;  %1459 = vmatprep.subr.bf16.mxu1 %v1686_v36 }
 0x1aa   : > { %1481 = vmatprep.subr.bf16.mxu0 %v1686_v36 }
 0x1ac   : > { %1460 = vmatpush3.bf16.msra.mxu1 %v1687_v37 }
 0x1ad   : > { %1482 = vmatpush3.bf16.msra.mxu0 %v1687_v37  ;;  %1461 = vmatprep.subr.bf16.mxu1 %v1688_v38 }
 0x1ae   : > { %1483 = vmatprep.subr.bf16.mxu0 %v1688_v38 }
 0x1b0   : > { %1462 = vmatpush3.bf16.msra.mxu1 %v1689_v39 }
 0x1b1   : > { %1484 = vmatpush3.bf16.msra.mxu0 %v1689_v39  ;;  %1463 = vmatprep.subr.bf16.mxu1 %v1690_v40 }
 0x1b2   : > { %1485 = vmatprep.subr.bf16.mxu0 %v1690_v40 }
 0x1b4   : > { %1464 = vmatpush3.bf16.msra.mxu1 %v1691_v41 }
 0x1b5   : > { %1486 = vmatpush3.bf16.msra.mxu0 %v1691_v41 }
 0x269   : > { %v969_v43 = vpop.f32.mrb[0].mxu1 }
 0x26a   : > { %v970_v44 = vadd.f32 %v969_v43, %v891_v42  ;;  %v1200_v45 = vpop.f32.mrb[0].mxu0  ;;  %v971_v46 = vpop.f32.mrb[1].mxu1 }
 0x26b   : > { %v1201_v47 = vadd.f32 %v1200_v45, %v891_v42  ;;  %v972_v48 = vadd.f32 %v971_v46, %v891_v42  ;;  %v1202_v49 = vpop.f32.mrb[1].mxu0 }
 0x26c   : > { %v974_v50 = vmax.f32 %v970_v44, 0.0  ;;  %v1203_v51 = vadd.f32 %v1202_v49, %v891_v42 }
 0x26d   : > { %v1205_v52 = vmax.f32 %v1201_v47, 0.0  ;;  %v975_v53 = vmax.f32 %v972_v48, 0.0 }
 0x26e   : > { %v1206_v54 = vmax.f32 %v1203_v51, 0.0  ;;  %v976_v56 = vpack.c.bf16 %v974_v50, %v974_v50 }
 0x26f   : > { %v977_v55 = vpack.c.bf16 %v975_v53, %v975_v53  ;;  %v1207_v58 = vpack.c.bf16 %v1205_v52, %v1205_v52 }
 0x270   : > { %v1208_v57 = vpack.c.bf16 %v1206_v54, %v1206_v54 }
 0x271   : > { %1107 = vmatprep.mubr.bf16.mxu1 %v977_v55 }
 0x272   : > { %1242 = vmatprep.mubr.bf16.mxu0 %v1208_v57  ;;  %1108 = vmatmul.mubr.bf16.vlgmr.msra.gmra.mrb[4].mxu1 %v976_v56 }
 0x273   : > { %1243 = vmatmul.mubr.bf16.vlgmr.msra.gmra.mrb[4].mxu0 %v1207_v58 }
 0x345   : > { %v1465_v59 = vpop.f32.mrb[4].mxu1 }
 0x346   : > { %v1487_v60 = vpop.f32.mrb[4].mxu0  ;;  %v1466_v5 = vpop.f32.mrb[5].mxu1  ;;  %1255 = sbr.rel (%p1445_p9) target bundleno = 855 (0x357), region = 72 }
 0x347   : > { %v1467_v62 = vadd.f32 %v1466_v5, %v1465_v59  ;;  %v1488_v63 = vpop.f32.mrb[5].mxu0  ;;  %v1468_v0 = vpop.f32.mrb[6].mxu1 }
 0x348   : > { %v1489_v1 = vadd.f32 %v1488_v63, %v1487_v60  ;;  %v1490_v2 = vpop.f32.mrb[6].mxu0  ;;  %v1469_v3 = vpop.f32.mrb[7].mxu1 }
 0x349   : > { %v1115_v4 = vadd.f32 %v1467_v62, %v978_v61  ;;  %v1491_v21 = vpop.f32.mrb[7].mxu0 }
 0x34a   : > { %v1250_v7 = vadd.f32 %v1489_v1, %v1209_v6 }
 0x34b   : > { %1116 = vst [vmem:[#allocation3] sm:$0x1] %v1115_v4 }
 0x34c   : > { %1251 = vst [vmem:[#allocation3 + $0x1] sm:$0x1] %v1250_v7 }
 0x353   : > { %v1256_v8 = vld [vmem:[#allocation3] sm:$0x3] }
 0x354   : > { %v1264_v10 = vadd.f32 %v1446_v9, %v1256_v8 }
 0x356   : > { %1265 = vst [vmem:[%s2395_s26] sm:$0x3] %v1264_v10 }
 0x357 PF: > { %s24_s10 = sadd.s32 1, %s1953_s10   ;;  %s2666_s24 = sld [smem:[#allocation18_spill]] }
 0x358   : > { %p2550_p11 = scmp.ge.s32.totalorder %s24_s10, 34   ;;  %s2667_s25 = sld [smem:[#allocation19_spill]] }
 0x359   : > { %s2668_s26 = sld [smem:[#allocation27_spill]]  ;;  %s2669_s2 = sld [smem:[#allocation20_spill]] }
 0x35a   : > { %s2670_s29 = sld [smem:[#allocation26_spill]]  ;;  %s2671_s0 = sld [smem:[#allocation23_spill]] }
 0x35b   : > { %s2672_s8 = sld [smem:[#allocation24_spill]]  ;;  %s2673_s14 = sld [smem:[#allocation25_spill]] }
 0x35c   : > { %s2675_s21 = smov %s1905_s22  ;;  %s2676_s22 = smov %s1909_s23 }
 0x35d   : > { %s2677_s23 = smov %s2305_s30  ;;  %s2678_s27 = smov %s1929_s28 }
 0x35e   : > { %s2681_s7 = smov %s1949_s9  ;;  %23 = sbr.rel (!%p2550_p11) target bundleno = 16 (0x10), region = 137 }
 0x35f   : > { %s2679_s28 = smov %s2669_s2 }
 0x360   : > { %s2680_s30 = smov %s2671_s0 }
 0x361   : > { %s2682_s9 = smov %s2673_s14 }
 0x365   :  { %1285 = vsyncpa [#allocation5], 1 }
 0x366   :  { %1287 = vsyncpa [#allocation5 + $0x1], 1 }
 0x367   :  { %1288 = vsyncpa [#allocation8], 1 }
 0x368   :  { %1290 = vsyncpa [#allocation8 + $0x1], 1 }
 0x369   :  { %1291 = vsyncpa [#allocation12], 1 }
 0x36a   :  { %1293 = vsyncpa [#allocation12 + $0x1], 1 }
 0x36b   :  { %1294 = vsyncpa [#allocation6], 1 }
 0x36c   :  { %1296 = vsyncpa [#allocation6 + $0x1], 1 }

</bundles_post_ra>
